<compile_context>
chip_gen: v7x
topology: tpu7x:2x2x1
jax: 0.10.0
libtpu: 0.0.40
codegen_flags: <defaults>
</compile_context>

<pallas_src>
import functools

import jax
import jax.numpy as jnp
from jax.experimental import pallas as pl
from jax.experimental.pallas import tpu as pltpu

EPS = 1e-6
# MXU operand dtype: bf16 operands with f32 accumulation (2-4x MXU throughput,
# half the weight DMA).  Set to jnp.float32 for bit-exact f32 matmuls.
MATMUL_DTYPE = jnp.bfloat16


def _layernorm(x, gamma, beta, d):
    """Annotated-Transformer LayerNorm: a_2*(x-mean)/(std+eps)+b_2, unbiased std."""
    mean = jnp.mean(x, axis=-1, keepdims=True)
    var = jnp.sum((x - mean) ** 2, axis=-1, keepdims=True) * (1.0 / (d - 1))
    std = jnp.sqrt(var)
    inv = pl.reciprocal(std + EPS, approx=True)
    return gamma * (x - mean) * inv + beta


def _dense(x, w_ref, b_ref):
    """y = x @ W + b with bf16 MXU operands and f32 accumulation."""
    y = jnp.dot(x.astype(MATMUL_DTYPE), w_ref[...].astype(MATMUL_DTYPE),
                preferred_element_type=jnp.float32)
    return y + b_ref[...].astype(jnp.float32)


def encoder_layer_kernel(x_ref, mask_ref, ln_g_ref, ln_b_ref,
                         wqkv_ref, bqkv_ref, wo_ref, bo_ref,
                         w1_ref, b1_ref, w2_ref, b2_ref,
                         *rest, num_heads, fuse_final_norm):
    """One full pre-norm encoder layer for a tile of batch elements."""
    if fuse_final_norm:
        fin_g_ref, fin_b_ref, o_ref = rest
    else:
        (o_ref,) = rest

    x = x_ref[...].astype(jnp.float32)          # (Bt, S, D)
    mask = mask_ref[...]                        # (Bt, S, S)
    Bt, S, D = x.shape
    H = num_heads
    dh = D // H
    scale = 1.0 / (dh ** 0.5)

    ln_g = ln_g_ref[...].astype(jnp.float32)    # (1, D) -- the layer's single LayerNorm
    ln_b = ln_b_ref[...].astype(jnp.float32)

    # --- x1 = layer_norm(x) -------------------------------------------------
    x2d = x.reshape(Bt * S, D)                  # fold batch & seq -> dense MXU rows
    x1 = _layernorm(x2d, ln_g, ln_b, D)         # (Bt*S, D) f32

    # --- fused QKV projection: one wide matmul (N = 3D) ----------------------
    qkv = _dense(x1, wqkv_ref, bqkv_ref)        # (Bt*S, 3D) f32
    q = (qkv[:, :D] * scale).reshape(Bt, S, D)
    k = qkv[:, D:2 * D].reshape(Bt, S, D)
    v = qkv[:, 2 * D:].reshape(Bt, S, D)

    neg_mask = (mask == 0)                      # (Bt, S, S)

    # --- multi-head attention; accumulate the output projection per head so
    #     there is no lane-axis concat and the Wo matmul stays N=D wide.
    # TODO(synk): for long sequences stream KV blocks flash-attention style
    # (online softmax); at these sizes the full (S, S) scores fit in VMEM.
    wo = wo_ref[...].astype(MATMUL_DTYPE)       # (D, D)
    attn_out = jnp.zeros((Bt * S, D), jnp.float32)
    for h in range(H):                          # static unroll over heads
        sl = slice(h * dh, (h + 1) * dh)
        qh = q[:, :, sl].astype(MATMUL_DTYPE)   # (Bt, S, dh)
        kh = k[:, :, sl].astype(MATMUL_DTYPE)
        vh = v[:, :, sl].astype(MATMUL_DTYPE)
        s = jnp.einsum('bqd,bkd->bqk', qh, kh,
                       preferred_element_type=jnp.float32)        # (Bt, S, S) f32
        s = jnp.where(neg_mask, -1e9, s)
        s = s - jnp.max(s, axis=-1, keepdims=True)
        p = jnp.exp(s)
        p = p * pl.reciprocal(jnp.sum(p, axis=-1, keepdims=True), approx=True)
        ctx = jnp.einsum('bqk,bkd->bqd', p.astype(MATMUL_DTYPE), vh,
                         preferred_element_type=jnp.float32)       # (Bt, S, dh)
        attn_out = attn_out + jnp.dot(
            ctx.reshape(Bt * S, dh).astype(MATMUL_DTYPE), wo[sl, :],
            preferred_element_type=jnp.float32)
    attn_out = attn_out + bo_ref[...].astype(jnp.float32)

    # --- x2 = x1 + attn  (residual uses the normed x, exactly as in the module)
    # TODO(synk): dropout is treated as identity (eval mode).
    x2 = x1 + attn_out

    # --- out = x2 + feed_forward(layer_norm(x2))  (same LayerNorm params reused)
    x3 = _layernorm(x2, ln_g, ln_b, D)
    h1 = jnp.maximum(_dense(x3, w1_ref, b1_ref), 0.0)
    out = x2 + _dense(h1, w2_ref, b2_ref)

    if fuse_final_norm:                         # final encoder LayerNorm, fused
        out = _layernorm(out,
                         fin_g_ref[...].astype(jnp.float32),
                         fin_b_ref[...].astype(jnp.float32), D)

    o_ref[...] = out.reshape(Bt, S, D).astype(o_ref.dtype)


def _pick_block_b(B, S):
    """Largest divisor of B that keeps ~>=128 folded (batch*seq) matmul rows."""
    target = max(1, 128 // max(S, 1))
    best = 1
    for cand in range(1, B + 1):
        if B % cand == 0 and cand <= target:
            best = cand
    return best


def run_encoder_layer(x, mask, params, num_heads, final_norm=None, block_b=None):
    B, S, D = x.shape
    d_ff = params["w1"].shape[1]
    if block_b is None:
        block_b = _pick_block_b(B, S)
    assert B % block_b == 0
    grid = (B // block_b,)

    def rep(shape):
        # weights / biases: constant block index -> resident across the grid
        return pl.BlockSpec(shape, lambda b: (0,) * len(shape))

    in_specs = [
        pl.BlockSpec((block_b, S, D), lambda b: (b, 0, 0)),   # x
        pl.BlockSpec((block_b, S, S), lambda b: (b, 0, 0)),   # mask
        rep((1, D)), rep((1, D)),                             # layer norm gamma/beta
        rep((D, 3 * D)), rep((1, 3 * D)),                     # fused Wqkv / bqkv
        rep((D, D)), rep((1, D)),                             # Wo / bo
        rep((D, d_ff)), rep((1, d_ff)),                       # W1 / b1
        rep((d_ff, D)), rep((1, D)),                          # W2 / b2
    ]
    args = [x, mask, params["ln_g"], params["ln_b"],
            params["wqkv"], params["bqkv"], params["wo"], params["bo"],
            params["w1"], params["b1"], params["w2"], params["b2"]]

    fuse_final_norm = final_norm is not None
    if fuse_final_norm:
        in_specs += [rep((1, D)), rep((1, D))]
        args += [final_norm[0], final_norm[1]]

    kernel = functools.partial(encoder_layer_kernel, num_heads=num_heads,
                               fuse_final_norm=fuse_final_norm)
    return pl.pallas_call(
        kernel,
        out_shape=jax.ShapeDtypeStruct((B, S, D), jnp.float32),
        grid=grid,
        in_specs=in_specs,
        out_specs=pl.BlockSpec((block_b, S, D), lambda b: (b, 0, 0)),
        compiler_params=pltpu.CompilerParams(
            dimension_semantics=("parallel",),      # independent batch tiles
            vmem_limit_bytes=48 * 1024 * 1024),
    )(*args)


def init_layer_params(key, d_model, d_ff, w_dtype=MATMUL_DTYPE):
    ks = jax.random.split(key, 4)
    scale = 0.02

    def w(k, shape):
        return (scale * jax.random.normal(k, shape, jnp.float32)).astype(w_dtype)

    return {
        "ln_g": jnp.ones((1, d_model), jnp.float32),
        "ln_b": jnp.zeros((1, d_model), jnp.float32),
        "wqkv": w(ks[0], (d_model, 3 * d_model)),   # pre-transposed (in, 3*out)
        "bqkv": jnp.zeros((1, 3 * d_model), jnp.float32),
        "wo": w(ks[1], (d_model, d_model)),
        "bo": jnp.zeros((1, d_model), jnp.float32),
        "w1": w(ks[2], (d_model, d_ff)),
        "b1": jnp.zeros((1, d_ff), jnp.float32),
        "w2": w(ks[3], (d_ff, d_model)),
        "b2": jnp.zeros((1, d_model), jnp.float32),
    }


def transformer_encoder(x, mask, layer_params, final_gamma, final_beta, num_heads):
    n = len(layer_params)
    assert n >= 1, "need at least one encoder layer"
    for i, p in enumerate(layer_params):
        fn = (final_gamma, final_beta) if i == n - 1 else None
        x = run_encoder_layer(x, mask, p, num_heads, final_norm=fn)
    return x


if __name__ == "__main__":
    # Small configuration consistent with the module: N layers of
    # (pre-LayerNorm + MHA + FFN) followed by a final LayerNorm.
    N = 2
    B, S = 2, 8
    d_model, num_heads = 32, 4
    d_ff = 4 * d_model

    key = jax.random.PRNGKey(0)
    kx, *layer_keys = jax.random.split(key, N + 1)

    x = jax.random.normal(kx, (B, S, d_model), jnp.float32)
    mask = jnp.ones((B, S, S), jnp.float32)   # no masking (all positions attend)

    layer_params = [init_layer_params(k, d_model, d_ff) for k in layer_keys]
    final_gamma = jnp.ones((1, d_model), jnp.float32)
    final_beta = jnp.zeros((1, d_model), jnp.float32)

    out = transformer_encoder(x, mask, layer_params, final_gamma, final_beta, num_heads)
    jax.block_until_ready(out)
    assert out.shape == (B, S, d_model)
    print("KERNEL_OK")
</pallas_src>

<mosaic_0001>
module attributes {stable_mosaic.version = 11 : i64} {
  func.func @encoder_layer_kernel(%arg0: i32, %arg1: memref<2x8x32xf32, #tpu.memory_space<vmem>>, %arg2: memref<2x8x8xf32, #tpu.memory_space<vmem>>, %arg3: memref<1x32xf32, #tpu.memory_space<vmem>>, %arg4: memref<1x32xf32, #tpu.memory_space<vmem>>, %arg5: memref<32x96xbf16, #tpu.memory_space<vmem>>, %arg6: memref<1x96xf32, #tpu.memory_space<vmem>>, %arg7: memref<32x32xbf16, #tpu.memory_space<vmem>>, %arg8: memref<1x32xf32, #tpu.memory_space<vmem>>, %arg9: memref<32x128xbf16, #tpu.memory_space<vmem>>, %arg10: memref<1x128xf32, #tpu.memory_space<vmem>>, %arg11: memref<128x32xbf16, #tpu.memory_space<vmem>>, %arg12: memref<1x32xf32, #tpu.memory_space<vmem>>, %arg13: memref<2x8x32xf32, #tpu.memory_space<vmem>>) attributes {dimension_semantics = [#tpu.dimension_semantics<parallel>], iteration_bounds = array<i64: 1>, scalar_prefetch = 0 : i64, scratch_operands = 0 : i64, tpu.core_type = #tpu.core_type<tc>, window_params = [{transform_indices = @transform_0, window_bounds = array<i64: 2, 8, 32>}, {transform_indices = @transform_1, window_bounds = array<i64: 2, 8, 8>}, {pipeline_mode = #tpu.pipeline_mode<synchronous>, transform_indices = @transform_2, window_bounds = array<i64: 1, 32>}, {pipeline_mode = #tpu.pipeline_mode<synchronous>, transform_indices = @transform_3, window_bounds = array<i64: 1, 32>}, {pipeline_mode = #tpu.pipeline_mode<synchronous>, transform_indices = @transform_4, window_bounds = array<i64: 32, 96>}, {pipeline_mode = #tpu.pipeline_mode<synchronous>, transform_indices = @transform_5, window_bounds = array<i64: 1, 96>}, {pipeline_mode = #tpu.pipeline_mode<synchronous>, transform_indices = @transform_6, window_bounds = array<i64: 32, 32>}, {pipeline_mode = #tpu.pipeline_mode<synchronous>, transform_indices = @transform_7, window_bounds = array<i64: 1, 32>}, {pipeline_mode = #tpu.pipeline_mode<synchronous>, transform_indices = @transform_8, window_bounds = array<i64: 32, 128>}, {pipeline_mode = #tpu.pipeline_mode<synchronous>, transform_indices = @transform_9, window_bounds = array<i64: 1, 128>}, {pipeline_mode = #tpu.pipeline_mode<synchronous>, transform_indices = @transform_10, window_bounds = array<i64: 128, 32>}, {pipeline_mode = #tpu.pipeline_mode<synchronous>, transform_indices = @transform_11, window_bounds = array<i64: 1, 32>}, {transform_indices = @transform_12, window_bounds = array<i64: 2, 8, 32>}]} {
    %c0 = arith.constant 0 : index
    %c0_0 = arith.constant 0 : index
    %c0_1 = arith.constant 0 : index
    %0 = vector.load %arg1[%c0, %c0_0, %c0_1] : memref<2x8x32xf32, #tpu.memory_space<vmem>>, vector<2x8x32xf32>
    %c0_2 = arith.constant 0 : index
    %c0_3 = arith.constant 0 : index
    %c0_4 = arith.constant 0 : index
    %1 = vector.load %arg2[%c0_2, %c0_3, %c0_4] : memref<2x8x8xf32, #tpu.memory_space<vmem>>, vector<2x8x8xf32>
    %c0_5 = arith.constant 0 : index
    %c0_6 = arith.constant 0 : index
    %2 = vector.load %arg3[%c0_5, %c0_6] : memref<1x32xf32, #tpu.memory_space<vmem>>, vector<1x32xf32>
    %c0_7 = arith.constant 0 : index
    %c0_8 = arith.constant 0 : index
    %3 = vector.load %arg4[%c0_7, %c0_8] : memref<1x32xf32, #tpu.memory_space<vmem>>, vector<1x32xf32>
    %4 = vector.shape_cast %0 : vector<2x8x32xf32> to vector<16x32xf32>
    %cst = arith.constant dense<0.000000e+00> : vector<16xf32>
    %5 = vector.multi_reduction <add>, %4, %cst [1] : vector<16x32xf32> to vector<16xf32>
    %6 = vector.shape_cast %5 : vector<16xf32> to vector<16x1xf32>
    %cst_9 = arith.constant 3.200000e+01 : f32
    %7 = vector.broadcast %cst_9 : f32 to vector<16x1xf32>
    %8 = arith.divf %6, %7 : vector<16x1xf32>
    %9 = vector.broadcast %8 : vector<16x1xf32> to vector<16x32xf32>
    %10 = arith.subf %4, %9 : vector<16x32xf32>
    %11 = arith.mulf %10, %10 : vector<16x32xf32>
    %cst_10 = arith.constant dense<0.000000e+00> : vector<16xf32>
    %12 = vector.multi_reduction <add>, %11, %cst_10 [1] : vector<16x32xf32> to vector<16xf32>
    %13 = vector.shape_cast %12 : vector<16xf32> to vector<16x1xf32>
    %cst_11 = arith.constant 0.0322580636 : f32
    %14 = vector.broadcast %cst_11 : f32 to vector<16x1xf32>
    %15 = arith.mulf %13, %14 : vector<16x1xf32>
    %16 = math.sqrt %15 : vector<16x1xf32>
    %cst_12 = arith.constant 9.99999997E-7 : f32
    %17 = vector.broadcast %cst_12 : f32 to vector<16x1xf32>
    %18 = arith.addf %16, %17 : vector<16x1xf32>
    %19 = tpu.reciprocal %18 {approx = true} : vector<16x1xf32> -> vector<16x1xf32>
    %20 = vector.broadcast %8 : vector<16x1xf32> to vector<16x32xf32>
    %21 = arith.subf %4, %20 : vector<16x32xf32>
    %22 = vector.broadcast %2 : vector<1x32xf32> to vector<16x32xf32>
    %23 = arith.mulf %22, %21 : vector<16x32xf32>
    %24 = vector.broadcast %19 : vector<16x1xf32> to vector<16x32xf32>
    %25 = arith.mulf %23, %24 : vector<16x32xf32>
    %26 = vector.broadcast %3 : vector<1x32xf32> to vector<16x32xf32>
    %27 = arith.addf %25, %26 : vector<16x32xf32>
    %28 = arith.truncf %27 : vector<16x32xf32> to vector<16x32xbf16>
    %c0_13 = arith.constant 0 : index
    %c0_14 = arith.constant 0 : index
    %29 = vector.load %arg5[%c0_13, %c0_14] : memref<32x96xbf16, #tpu.memory_space<vmem>>, vector<32x96xbf16>
    %cst_15 = arith.constant dense<0.000000e+00> : vector<16x96xf32>
    %30 = tpu.matmul %28, %29, %cst_15 {dimension_numbers = #tpu.dot_dimension_numbers<[1], [0], [0], [1], [0, 0, 1, 1], [], []>} : vector<16x32xbf16>, vector<32x96xbf16>, vector<16x96xf32> -> vector<16x96xf32>
    %c0_16 = arith.constant 0 : index
    %c0_17 = arith.constant 0 : index
    %31 = vector.load %arg6[%c0_16, %c0_17] : memref<1x96xf32, #tpu.memory_space<vmem>>, vector<1x96xf32>
    %32 = vector.broadcast %31 : vector<1x96xf32> to vector<16x96xf32>
    %33 = arith.addf %30, %32 : vector<16x96xf32>
    %34 = vector.extract_strided_slice %33 {offsets = [0, 0], sizes = [16, 32], strides = [1, 1]} : vector<16x96xf32> to vector<16x32xf32>
    %cst_18 = arith.constant 0.353553385 : f32
    %35 = vector.broadcast %cst_18 : f32 to vector<16x32xf32>
    %36 = arith.mulf %34, %35 : vector<16x32xf32>
    %37 = vector.shape_cast %36 : vector<16x32xf32> to vector<2x8x32xf32>
    %38 = vector.extract_strided_slice %33 {offsets = [0, 32], sizes = [16, 32], strides = [1, 1]} : vector<16x96xf32> to vector<16x32xf32>
    %39 = vector.shape_cast %38 : vector<16x32xf32> to vector<2x8x32xf32>
    %40 = vector.extract_strided_slice %33 {offsets = [0, 64], sizes = [16, 32], strides = [1, 1]} : vector<16x96xf32> to vector<16x32xf32>
    %41 = vector.shape_cast %40 : vector<16x32xf32> to vector<2x8x32xf32>
    %cst_19 = arith.constant 0.000000e+00 : f32
    %42 = vector.broadcast %cst_19 : f32 to vector<2x8x8xf32>
    %43 = arith.cmpf oeq, %1, %42 : vector<2x8x8xf32>
    %c0_20 = arith.constant 0 : index
    %c0_21 = arith.constant 0 : index
    %44 = vector.load %arg7[%c0_20, %c0_21] : memref<32x32xbf16, #tpu.memory_space<vmem>>, vector<32x32xbf16>
    %cst_22 = arith.constant 0.000000e+00 : f32
    %45 = vector.broadcast %cst_22 : f32 to vector<16x32xf32>
    %46 = vector.extract_strided_slice %37 {offsets = [0, 0, 0], sizes = [2, 8, 8], strides = [1, 1, 1]} : vector<2x8x32xf32> to vector<2x8x8xf32>
    %47 = arith.truncf %46 : vector<2x8x8xf32> to vector<2x8x8xbf16>
    %48 = vector.extract_strided_slice %39 {offsets = [0, 0, 0], sizes = [2, 8, 8], strides = [1, 1, 1]} : vector<2x8x32xf32> to vector<2x8x8xf32>
    %49 = arith.truncf %48 : vector<2x8x8xf32> to vector<2x8x8xbf16>
    %50 = vector.extract_strided_slice %41 {offsets = [0, 0, 0], sizes = [2, 8, 8], strides = [1, 1, 1]} : vector<2x8x32xf32> to vector<2x8x8xf32>
    %51 = arith.truncf %50 : vector<2x8x8xf32> to vector<2x8x8xbf16>
    "tpu.trace_start"() <{level = 10 : i32, message = "bqd,bkd->bqk"}> : () -> ()
    %cst_23 = arith.constant dense<0.000000e+00> : vector<2x8x8xf32>
    %52 = tpu.matmul %47, %49, %cst_23 {dimension_numbers = #tpu.dot_dimension_numbers<[2], [2], [1], [1], [0, 0, 0, 1, 1, 1], [0], [0]>} : vector<2x8x8xbf16>, vector<2x8x8xbf16>, vector<2x8x8xf32> -> vector<2x8x8xf32>
    %cst_24 = arith.constant -1.000000e+09 : f32
    "tpu.trace_stop"() : () -> ()
    %53 = vector.broadcast %cst_24 : f32 to vector<2x8x8xf32>
    %54 = arith.select %43, %53, %52 : vector<2x8x8xi1>, vector<2x8x8xf32>
    %cst_25 = arith.constant dense<0xFF800000> : vector<2x8xf32>
    %55 = vector.multi_reduction <maximumf>, %54, %cst_25 [2] : vector<2x8x8xf32> to vector<2x8xf32>
    %56 = vector.shape_cast %55 : vector<2x8xf32> to vector<2x8x1xf32>
    %57 = vector.broadcast %56 : vector<2x8x1xf32> to vector<2x8x8xf32>
    %58 = arith.subf %54, %57 : vector<2x8x8xf32>
    %59 = math.exp %58 : vector<2x8x8xf32>
    %cst_26 = arith.constant dense<0.000000e+00> : vector<2x8xf32>
    %60 = vector.multi_reduction <add>, %59, %cst_26 [2] : vector<2x8x8xf32> to vector<2x8xf32>
    %61 = vector.shape_cast %60 : vector<2x8xf32> to vector<2x8x1xf32>
    %62 = tpu.reciprocal %61 {approx = true} : vector<2x8x1xf32> -> vector<2x8x1xf32>
    %63 = vector.broadcast %62 : vector<2x8x1xf32> to vector<2x8x8xf32>
    %64 = arith.mulf %59, %63 : vector<2x8x8xf32>
    %65 = arith.truncf %64 : vector<2x8x8xf32> to vector<2x8x8xbf16>
    "tpu.trace_start"() <{level = 10 : i32, message = "bqk,bkd->bqd"}> : () -> ()
    %cst_27 = arith.constant dense<0.000000e+00> : vector<2x8x8xf32>
    %66 = tpu.matmul %65, %51, %cst_27 {dimension_numbers = #tpu.dot_dimension_numbers<[2], [1], [1], [2], [0, 0, 0, 1, 1, 2], [0], [0]>} : vector<2x8x8xbf16>, vector<2x8x8xbf16>, vector<2x8x8xf32> -> vector<2x8x8xf32>
    "tpu.trace_stop"() : () -> ()
    %67 = vector.shape_cast %66 : vector<2x8x8xf32> to vector<16x8xf32>
    %68 = arith.truncf %67 : vector<16x8xf32> to vector<16x8xbf16>
    %69 = vector.extract_strided_slice %44 {offsets = [0, 0], sizes = [8, 32], strides = [1, 1]} : vector<32x32xbf16> to vector<8x32xbf16>
    %cst_28 = arith.constant dense<0.000000e+00> : vector<16x32xf32>
    %70 = tpu.matmul %68, %69, %cst_28 {dimension_numbers = #tpu.dot_dimension_numbers<[1], [0], [0], [1], [0, 0, 1, 1], [], []>} : vector<16x8xbf16>, vector<8x32xbf16>, vector<16x32xf32> -> vector<16x32xf32>
    %71 = arith.addf %45, %70 : vector<16x32xf32>
    %72 = vector.extract_strided_slice %37 {offsets = [0, 0, 8], sizes = [2, 8, 8], strides = [1, 1, 1]} : vector<2x8x32xf32> to vector<2x8x8xf32>
    %73 = arith.truncf %72 : vector<2x8x8xf32> to vector<2x8x8xbf16>
    %74 = vector.extract_strided_slice %39 {offsets = [0, 0, 8], sizes = [2, 8, 8], strides = [1, 1, 1]} : vector<2x8x32xf32> to vector<2x8x8xf32>
    %75 = arith.truncf %74 : vector<2x8x8xf32> to vector<2x8x8xbf16>
    %76 = vector.extract_strided_slice %41 {offsets = [0, 0, 8], sizes = [2, 8, 8], strides = [1, 1, 1]} : vector<2x8x32xf32> to vector<2x8x8xf32>
    %77 = arith.truncf %76 : vector<2x8x8xf32> to vector<2x8x8xbf16>
    "tpu.trace_start"() <{level = 10 : i32, message = "bqd,bkd->bqk"}> : () -> ()
    %cst_29 = arith.constant dense<0.000000e+00> : vector<2x8x8xf32>
    %78 = tpu.matmul %73, %75, %cst_29 {dimension_numbers = #tpu.dot_dimension_numbers<[2], [2], [1], [1], [0, 0, 0, 1, 1, 1], [0], [0]>} : vector<2x8x8xbf16>, vector<2x8x8xbf16>, vector<2x8x8xf32> -> vector<2x8x8xf32>
    %cst_30 = arith.constant -1.000000e+09 : f32
    "tpu.trace_stop"() : () -> ()
    %79 = vector.broadcast %cst_30 : f32 to vector<2x8x8xf32>
    %80 = arith.select %43, %79, %78 : vector<2x8x8xi1>, vector<2x8x8xf32>
    %cst_31 = arith.constant dense<0xFF800000> : vector<2x8xf32>
    %81 = vector.multi_reduction <maximumf>, %80, %cst_31 [2] : vector<2x8x8xf32> to vector<2x8xf32>
    %82 = vector.shape_cast %81 : vector<2x8xf32> to vector<2x8x1xf32>
    %83 = vector.broadcast %82 : vector<2x8x1xf32> to vector<2x8x8xf32>
    %84 = arith.subf %80, %83 : vector<2x8x8xf32>
    %85 = math.exp %84 : vector<2x8x8xf32>
    %cst_32 = arith.constant dense<0.000000e+00> : vector<2x8xf32>
    %86 = vector.multi_reduction <add>, %85, %cst_32 [2] : vector<2x8x8xf32> to vector<2x8xf32>
    %87 = vector.shape_cast %86 : vector<2x8xf32> to vector<2x8x1xf32>
    %88 = tpu.reciprocal %87 {approx = true} : vector<2x8x1xf32> -> vector<2x8x1xf32>
    %89 = vector.broadcast %88 : vector<2x8x1xf32> to vector<2x8x8xf32>
    %90 = arith.mulf %85, %89 : vector<2x8x8xf32>
    %91 = arith.truncf %90 : vector<2x8x8xf32> to vector<2x8x8xbf16>
    "tpu.trace_start"() <{level = 10 : i32, message = "bqk,bkd->bqd"}> : () -> ()
    %cst_33 = arith.constant dense<0.000000e+00> : vector<2x8x8xf32>
    %92 = tpu.matmul %91, %77, %cst_33 {dimension_numbers = #tpu.dot_dimension_numbers<[2], [1], [1], [2], [0, 0, 0, 1, 1, 2], [0], [0]>} : vector<2x8x8xbf16>, vector<2x8x8xbf16>, vector<2x8x8xf32> -> vector<2x8x8xf32>
    "tpu.trace_stop"() : () -> ()
    %93 = vector.shape_cast %92 : vector<2x8x8xf32> to vector<16x8xf32>
    %94 = arith.truncf %93 : vector<16x8xf32> to vector<16x8xbf16>
    %95 = vector.extract_strided_slice %44 {offsets = [8, 0], sizes = [8, 32], strides = [1, 1]} : vector<32x32xbf16> to vector<8x32xbf16>
    %cst_34 = arith.constant dense<0.000000e+00> : vector<16x32xf32>
    %96 = tpu.matmul %94, %95, %cst_34 {dimension_numbers = #tpu.dot_dimension_numbers<[1], [0], [0], [1], [0, 0, 1, 1], [], []>} : vector<16x8xbf16>, vector<8x32xbf16>, vector<16x32xf32> -> vector<16x32xf32>
    %97 = arith.addf %71, %96 : vector<16x32xf32>
    %98 = vector.extract_strided_slice %37 {offsets = [0, 0, 16], sizes = [2, 8, 8], strides = [1, 1, 1]} : vector<2x8x32xf32> to vector<2x8x8xf32>
    %99 = arith.truncf %98 : vector<2x8x8xf32> to vector<2x8x8xbf16>
    %100 = vector.extract_strided_slice %39 {offsets = [0, 0, 16], sizes = [2, 8, 8], strides = [1, 1, 1]} : vector<2x8x32xf32> to vector<2x8x8xf32>
    %101 = arith.truncf %100 : vector<2x8x8xf32> to vector<2x8x8xbf16>
    %102 = vector.extract_strided_slice %41 {offsets = [0, 0, 16], sizes = [2, 8, 8], strides = [1, 1, 1]} : vector<2x8x32xf32> to vector<2x8x8xf32>
    %103 = arith.truncf %102 : vector<2x8x8xf32> to vector<2x8x8xbf16>
    "tpu.trace_start"() <{level = 10 : i32, message = "bqd,bkd->bqk"}> : () -> ()
    %cst_35 = arith.constant dense<0.000000e+00> : vector<2x8x8xf32>
    %104 = tpu.matmul %99, %101, %cst_35 {dimension_numbers = #tpu.dot_dimension_numbers<[2], [2], [1], [1], [0, 0, 0, 1, 1, 1], [0], [0]>} : vector<2x8x8xbf16>, vector<2x8x8xbf16>, vector<2x8x8xf32> -> vector<2x8x8xf32>
    %cst_36 = arith.constant -1.000000e+09 : f32
    "tpu.trace_stop"() : () -> ()
    %105 = vector.broadcast %cst_36 : f32 to vector<2x8x8xf32>
    %106 = arith.select %43, %105, %104 : vector<2x8x8xi1>, vector<2x8x8xf32>
    %cst_37 = arith.constant dense<0xFF800000> : vector<2x8xf32>
    %107 = vector.multi_reduction <maximumf>, %106, %cst_37 [2] : vector<2x8x8xf32> to vector<2x8xf32>
    %108 = vector.shape_cast %107 : vector<2x8xf32> to vector<2x8x1xf32>
    %109 = vector.broadcast %108 : vector<2x8x1xf32> to vector<2x8x8xf32>
    %110 = arith.subf %106, %109 : vector<2x8x8xf32>
    %111 = math.exp %110 : vector<2x8x8xf32>
    %cst_38 = arith.constant dense<0.000000e+00> : vector<2x8xf32>
    %112 = vector.multi_reduction <add>, %111, %cst_38 [2] : vector<2x8x8xf32> to vector<2x8xf32>
    %113 = vector.shape_cast %112 : vector<2x8xf32> to vector<2x8x1xf32>
    %114 = tpu.reciprocal %113 {approx = true} : vector<2x8x1xf32> -> vector<2x8x1xf32>
    %115 = vector.broadcast %114 : vector<2x8x1xf32> to vector<2x8x8xf32>
    %116 = arith.mulf %111, %115 : vector<2x8x8xf32>
    %117 = arith.truncf %116 : vector<2x8x8xf32> to vector<2x8x8xbf16>
    "tpu.trace_start"() <{level = 10 : i32, message = "bqk,bkd->bqd"}> : () -> ()
    %cst_39 = arith.constant dense<0.000000e+00> : vector<2x8x8xf32>
    %118 = tpu.matmul %117, %103, %cst_39 {dimension_numbers = #tpu.dot_dimension_numbers<[2], [1], [1], [2], [0, 0, 0, 1, 1, 2], [0], [0]>} : vector<2x8x8xbf16>, vector<2x8x8xbf16>, vector<2x8x8xf32> -> vector<2x8x8xf32>
    "tpu.trace_stop"() : () -> ()
    %119 = vector.shape_cast %118 : vector<2x8x8xf32> to vector<16x8xf32>
    %120 = arith.truncf %119 : vector<16x8xf32> to vector<16x8xbf16>
    %121 = vector.extract_strided_slice %44 {offsets = [16, 0], sizes = [8, 32], strides = [1, 1]} : vector<32x32xbf16> to vector<8x32xbf16>
    %cst_40 = arith.constant dense<0.000000e+00> : vector<16x32xf32>
    %122 = tpu.matmul %120, %121, %cst_40 {dimension_numbers = #tpu.dot_dimension_numbers<[1], [0], [0], [1], [0, 0, 1, 1], [], []>} : vector<16x8xbf16>, vector<8x32xbf16>, vector<16x32xf32> -> vector<16x32xf32>
    %123 = arith.addf %97, %122 : vector<16x32xf32>
    %124 = vector.extract_strided_slice %37 {offsets = [0, 0, 24], sizes = [2, 8, 8], strides = [1, 1, 1]} : vector<2x8x32xf32> to vector<2x8x8xf32>
    %125 = arith.truncf %124 : vector<2x8x8xf32> to vector<2x8x8xbf16>
    %126 = vector.extract_strided_slice %39 {offsets = [0, 0, 24], sizes = [2, 8, 8], strides = [1, 1, 1]} : vector<2x8x32xf32> to vector<2x8x8xf32>
    %127 = arith.truncf %126 : vector<2x8x8xf32> to vector<2x8x8xbf16>
    %128 = vector.extract_strided_slice %41 {offsets = [0, 0, 24], sizes = [2, 8, 8], strides = [1, 1, 1]} : vector<2x8x32xf32> to vector<2x8x8xf32>
    %129 = arith.truncf %128 : vector<2x8x8xf32> to vector<2x8x8xbf16>
    "tpu.trace_start"() <{level = 10 : i32, message = "bqd,bkd->bqk"}> : () -> ()
    %cst_41 = arith.constant dense<0.000000e+00> : vector<2x8x8xf32>
    %130 = tpu.matmul %125, %127, %cst_41 {dimension_numbers = #tpu.dot_dimension_numbers<[2], [2], [1], [1], [0, 0, 0, 1, 1, 1], [0], [0]>} : vector<2x8x8xbf16>, vector<2x8x8xbf16>, vector<2x8x8xf32> -> vector<2x8x8xf32>
    %cst_42 = arith.constant -1.000000e+09 : f32
    "tpu.trace_stop"() : () -> ()
    %131 = vector.broadcast %cst_42 : f32 to vector<2x8x8xf32>
    %132 = arith.select %43, %131, %130 : vector<2x8x8xi1>, vector<2x8x8xf32>
    %cst_43 = arith.constant dense<0xFF800000> : vector<2x8xf32>
    %133 = vector.multi_reduction <maximumf>, %132, %cst_43 [2] : vector<2x8x8xf32> to vector<2x8xf32>
    %134 = vector.shape_cast %133 : vector<2x8xf32> to vector<2x8x1xf32>
    %135 = vector.broadcast %134 : vector<2x8x1xf32> to vector<2x8x8xf32>
    %136 = arith.subf %132, %135 : vector<2x8x8xf32>
    %137 = math.exp %136 : vector<2x8x8xf32>
    %cst_44 = arith.constant dense<0.000000e+00> : vector<2x8xf32>
    %138 = vector.multi_reduction <add>, %137, %cst_44 [2] : vector<2x8x8xf32> to vector<2x8xf32>
    %139 = vector.shape_cast %138 : vector<2x8xf32> to vector<2x8x1xf32>
    %140 = tpu.reciprocal %139 {approx = true} : vector<2x8x1xf32> -> vector<2x8x1xf32>
    %141 = vector.broadcast %140 : vector<2x8x1xf32> to vector<2x8x8xf32>
    %142 = arith.mulf %137, %141 : vector<2x8x8xf32>
    %143 = arith.truncf %142 : vector<2x8x8xf32> to vector<2x8x8xbf16>
    "tpu.trace_start"() <{level = 10 : i32, message = "bqk,bkd->bqd"}> : () -> ()
    %cst_45 = arith.constant dense<0.000000e+00> : vector<2x8x8xf32>
    %144 = tpu.matmul %143, %129, %cst_45 {dimension_numbers = #tpu.dot_dimension_numbers<[2], [1], [1], [2], [0, 0, 0, 1, 1, 2], [0], [0]>} : vector<2x8x8xbf16>, vector<2x8x8xbf16>, vector<2x8x8xf32> -> vector<2x8x8xf32>
    "tpu.trace_stop"() : () -> ()
    %145 = vector.shape_cast %144 : vector<2x8x8xf32> to vector<16x8xf32>
    %146 = arith.truncf %145 : vector<16x8xf32> to vector<16x8xbf16>
    %147 = vector.extract_strided_slice %44 {offsets = [24, 0], sizes = [8, 32], strides = [1, 1]} : vector<32x32xbf16> to vector<8x32xbf16>
    %cst_46 = arith.constant dense<0.000000e+00> : vector<16x32xf32>
    %148 = tpu.matmul %146, %147, %cst_46 {dimension_numbers = #tpu.dot_dimension_numbers<[1], [0], [0], [1], [0, 0, 1, 1], [], []>} : vector<16x8xbf16>, vector<8x32xbf16>, vector<16x32xf32> -> vector<16x32xf32>
    %149 = arith.addf %123, %148 : vector<16x32xf32>
    %c0_47 = arith.constant 0 : index
    %c0_48 = arith.constant 0 : index
    %150 = vector.load %arg8[%c0_47, %c0_48] : memref<1x32xf32, #tpu.memory_space<vmem>>, vector<1x32xf32>
    %151 = vector.broadcast %150 : vector<1x32xf32> to vector<16x32xf32>
    %152 = arith.addf %149, %151 : vector<16x32xf32>
    %153 = arith.addf %27, %152 : vector<16x32xf32>
    %cst_49 = arith.constant dense<0.000000e+00> : vector<16xf32>
    %154 = vector.multi_reduction <add>, %153, %cst_49 [1] : vector<16x32xf32> to vector<16xf32>
    %155 = vector.shape_cast %154 : vector<16xf32> to vector<16x1xf32>
    %cst_50 = arith.constant 3.200000e+01 : f32
    %156 = vector.broadcast %cst_50 : f32 to vector<16x1xf32>
    %157 = arith.divf %155, %156 : vector<16x1xf32>
    %158 = vector.broadcast %157 : vector<16x1xf32> to vector<16x32xf32>
    %159 = arith.subf %153, %158 : vector<16x32xf32>
    %160 = arith.mulf %159, %159 : vector<16x32xf32>
    %cst_51 = arith.constant dense<0.000000e+00> : vector<16xf32>
    %161 = vector.multi_reduction <add>, %160, %cst_51 [1] : vector<16x32xf32> to vector<16xf32>
    %162 = vector.shape_cast %161 : vector<16xf32> to vector<16x1xf32>
    %cst_52 = arith.constant 0.0322580636 : f32
    %163 = vector.broadcast %cst_52 : f32 to vector<16x1xf32>
    %164 = arith.mulf %162, %163 : vector<16x1xf32>
    %165 = math.sqrt %164 : vector<16x1xf32>
    %cst_53 = arith.constant 9.99999997E-7 : f32
    %166 = vector.broadcast %cst_53 : f32 to vector<16x1xf32>
    %167 = arith.addf %165, %166 : vector<16x1xf32>
    %168 = tpu.reciprocal %167 {approx = true} : vector<16x1xf32> -> vector<16x1xf32>
    %169 = vector.broadcast %157 : vector<16x1xf32> to vector<16x32xf32>
    %170 = arith.subf %153, %169 : vector<16x32xf32>
    %171 = vector.broadcast %2 : vector<1x32xf32> to vector<16x32xf32>
    %172 = arith.mulf %171, %170 : vector<16x32xf32>
    %173 = vector.broadcast %168 : vector<16x1xf32> to vector<16x32xf32>
    %174 = arith.mulf %172, %173 : vector<16x32xf32>
    %175 = vector.broadcast %3 : vector<1x32xf32> to vector<16x32xf32>
    %176 = arith.addf %174, %175 : vector<16x32xf32>
    %177 = arith.truncf %176 : vector<16x32xf32> to vector<16x32xbf16>
    %c0_54 = arith.constant 0 : index
    %c0_55 = arith.constant 0 : index
    %178 = vector.load %arg9[%c0_54, %c0_55] : memref<32x128xbf16, #tpu.memory_space<vmem>>, vector<32x128xbf16>
    %cst_56 = arith.constant dense<0.000000e+00> : vector<16x128xf32>
    %179 = tpu.matmul %177, %178, %cst_56 {dimension_numbers = #tpu.dot_dimension_numbers<[1], [0], [0], [1], [0, 0, 1, 1], [], []>} : vector<16x32xbf16>, vector<32x128xbf16>, vector<16x128xf32> -> vector<16x128xf32>
    %c0_57 = arith.constant 0 : index
    %c0_58 = arith.constant 0 : index
    %180 = vector.load %arg10[%c0_57, %c0_58] : memref<1x128xf32, #tpu.memory_space<vmem>>, vector<1x128xf32>
    %181 = vector.broadcast %180 : vector<1x128xf32> to vector<16x128xf32>
    %182 = arith.addf %179, %181 : vector<16x128xf32>
    %cst_59 = arith.constant 0.000000e+00 : f32
    %183 = vector.broadcast %cst_59 : f32 to vector<16x128xf32>
    %184 = arith.maximumf %182, %183 : vector<16x128xf32>
    %185 = arith.truncf %184 : vector<16x128xf32> to vector<16x128xbf16>
    %c0_60 = arith.constant 0 : index
    %c0_61 = arith.constant 0 : index
    %186 = vector.load %arg11[%c0_60, %c0_61] : memref<128x32xbf16, #tpu.memory_space<vmem>>, vector<128x32xbf16>
    %cst_62 = arith.constant dense<0.000000e+00> : vector<16x32xf32>
    %187 = tpu.matmul %185, %186, %cst_62 {dimension_numbers = #tpu.dot_dimension_numbers<[1], [0], [0], [1], [0, 0, 1, 1], [], []>} : vector<16x128xbf16>, vector<128x32xbf16>, vector<16x32xf32> -> vector<16x32xf32>
    %c0_63 = arith.constant 0 : index
    %c0_64 = arith.constant 0 : index
    %188 = vector.load %arg12[%c0_63, %c0_64] : memref<1x32xf32, #tpu.memory_space<vmem>>, vector<1x32xf32>
    %189 = vector.broadcast %188 : vector<1x32xf32> to vector<16x32xf32>
    %190 = arith.addf %187, %189 : vector<16x32xf32>
    %191 = arith.addf %153, %190 : vector<16x32xf32>
    %192 = vector.shape_cast %191 : vector<16x32xf32> to vector<2x8x32xf32>
    %c0_65 = arith.constant 0 : index
    %c0_66 = arith.constant 0 : index
    %c0_67 = arith.constant 0 : index
    %193 = vector.load %arg13[%c0_65, %c0_66, %c0_67] : memref<2x8x32xf32, #tpu.memory_space<vmem>>, vector<2x8x32xf32>
    tpu.vector_store %arg13[%c0_65, %c0_66, %c0_67], %192 {strides = array<i32>} : memref<2x8x32xf32, #tpu.memory_space<vmem>>, vector<2x8x32xf32>,
    return
  }
  func.func @transform_0(%arg0: i32) -> (i32, i32, i32) {
    %c0_i32 = arith.constant 0 : i32
    %c0_i32_0 = arith.constant 0 : i32
    %c0_i32_1 = arith.constant 0 : i32
    return %arg0, %c0_i32, %c0_i32_0 : i32, i32, i32
  }
  func.func @transform_1(%arg0: i32) -> (i32, i32, i32) {
    %c0_i32 = arith.constant 0 : i32
    %c0_i32_0 = arith.constant 0 : i32
    %c0_i32_1 = arith.constant 0 : i32
    return %arg0, %c0_i32, %c0_i32_0 : i32, i32, i32
  }
  func.func @transform_2(%arg0: i32) -> (i32, i32) {
    %c0_i32 = arith.constant 0 : i32
    %c0_i32_0 = arith.constant 0 : i32
    %c0_i32_1 = arith.constant 0 : i32
    return %c0_i32, %c0_i32_0 : i32, i32
  }
  func.func @transform_3(%arg0: i32) -> (i32, i32) {
    %c0_i32 = arith.constant 0 : i32
    %c0_i32_0 = arith.constant 0 : i32
    %c0_i32_1 = arith.constant 0 : i32
    return %c0_i32, %c0_i32_0 : i32, i32
  }
  func.func @transform_4(%arg0: i32) -> (i32, i32) {
    %c0_i32 = arith.constant 0 : i32
    %c0_i32_0 = arith.constant 0 : i32
    %c0_i32_1 = arith.constant 0 : i32
    return %c0_i32, %c0_i32_0 : i32, i32
  }
  func.func @transform_5(%arg0: i32) -> (i32, i32) {
    %c0_i32 = arith.constant 0 : i32
    %c0_i32_0 = arith.constant 0 : i32
    %c0_i32_1 = arith.constant 0 : i32
    return %c0_i32, %c0_i32_0 : i32, i32
  }
  func.func @transform_6(%arg0: i32) -> (i32, i32) {
    %c0_i32 = arith.constant 0 : i32
    %c0_i32_0 = arith.constant 0 : i32
    %c0_i32_1 = arith.constant 0 : i32
    return %c0_i32, %c0_i32_0 : i32, i32
  }
  func.func @transform_7(%arg0: i32) -> (i32, i32) {
    %c0_i32 = arith.constant 0 : i32
    %c0_i32_0 = arith.constant 0 : i32
    %c0_i32_1 = arith.constant 0 : i32
    return %c0_i32, %c0_i32_0 : i32, i32
  }
  func.func @transform_8(%arg0: i32) -> (i32, i32) {
    %c0_i32 = arith.constant 0 : i32
    %c0_i32_0 = arith.constant 0 : i32
    %c0_i32_1 = arith.constant 0 : i32
    return %c0_i32, %c0_i32_0 : i32, i32
  }
  func.func @transform_9(%arg0: i32) -> (i32, i32) {
    %c0_i32 = arith.constant 0 : i32
    %c0_i32_0 = arith.constant 0 : i32
    %c0_i32_1 = arith.constant 0 : i32
    return %c0_i32, %c0_i32_0 : i32, i32
  }
  func.func @transform_10(%arg0: i32) -> (i32, i32) {
    %c0_i32 = arith.constant 0 : i32
    %c0_i32_0 = arith.constant 0 : i32
    %c0_i32_1 = arith.constant 0 : i32
    return %c0_i32, %c0_i32_0 : i32, i32
  }
  func.func @transform_11(%arg0: i32) -> (i32, i32) {
    %c0_i32 = arith.constant 0 : i32
    %c0_i32_0 = arith.constant 0 : i32
    %c0_i32_1 = arith.constant 0 : i32
    return %c0_i32, %c0_i32_0 : i32, i32
  }
  func.func @transform_12(%arg0: i32) -> (i32, i32, i32) {
    %c0_i32 = arith.constant 0 : i32
    %c0_i32_0 = arith.constant 0 : i32
    %c0_i32_1 = arith.constant 0 : i32
    return %arg0, %c0_i32, %c0_i32_0 : i32, i32, i32
  }
}

</mosaic_0001>

<bundles_post_ra>
// kernel: tpu_custom_call.1
= control target key start
LH: loop header
LB: loop body
LE: loop exit
PB: predicated region body
PF: predicated region fallthrough
CT: control target
= control target key end

     0   :  { %vm49_vm0 = vcmask 261120   ;;  %s2302_s0 = inlined_call_operand.vmem [shape: f32[2,8,32], index: 0, kind: input, shape index: {}]   ;;  %s2303_s1 = inlined_call_operand.vmem [shape: f32[2,8,8], index: 1, kind: input, shape index: {}]   ;;  %s2304_s2 = inlined_call_operand.vmem [shape: f32[1,32], index: 2, kind: input, shape index: {}]   ;;  %s2305_s3 = inlined_call_operand.vmem [shape: f32[1,32], index: 3, kind: input, shape index: {}]   ;;  %s2306_s4 = inlined_call_operand.vmem [shape: bf16[32,96], index: 4, kind: input, shape index: {}]   ;;  %s2307_s5 = inlined_call_operand.vmem [shape: f32[1,96], index: 5, kind: input, shape index: {}]   ;;  %s2308_s6 = inlined_call_operand.vmem [shape: bf16[32,32], index: 6, kind: input, shape index: {}]   ;;  %s2309_s7 = inlined_call_operand.vmem [shape: f32[1,32], index: 7, kind: input, shape index: {}]   ;;  %s2310_s8 = inlined_call_operand.vmem [shape: bf16[32,128], index: 8, kind: input, shape index: {}]   ;;  %s2311_s9 = inlined_call_operand.vmem [shape: f32[1,128], index: 9, kind: input, shape index: {}]   ;;  %s2312_s10 = inlined_call_operand.vmem [shape: bf16[128,32], index: 10, kind: input, shape index: {}]   ;;  %s2313_s11 = inlined_call_operand.vmem [shape: f32[1,32], index: 11, kind: input, shape index: {}]   ;;  %s2314_s12 = inlined_call_operand.hbm [shape: f32[2,8,32], index: 12, kind: output, shape index: {}]  }
   0x1   :  { %v43_v0 = vld [vmem:[%s2302_s0] sm:$0xff]  ;;  %v44_v1 = vld [vmem:[%s2302_s0 + $0x8] sm:$0xff] }
   0x2   :  { %v50_v2 = vsel %vm49_vm0, %v43_v0, 0.0  ;;  %v53_v3 = vsel %vm49_vm0, %v44_v1, 0.0 }
   0x3   :  { %51 = vadd.xlane.f32.xlu0 %v50_v2 }
   0x7   :  { %54 = vadd.xlane.f32.xlu0 %v53_v3 }
   0x8   :  { %17 = vsyncpa [#allocation3], 0  ;;  %v1798_v14 = vld [vmem:[%s2306_s4] sm:$0xff]   ;;  %v1882_v15 = vmov 0.0   ;;  %vm1883_vm1 = vmmov 0   ;;  %v1799_v16 = vld [vmem:[%s2306_s4 + $0x8] sm:$0xff]  }
   0x9   :  { %1626 = vmatprep.subr.bf16.mxu1 %v1882_v15  ;;  %1630 = vmatprep.mubr.msk.bf16.mxu1 %vm1883_vm1, %v1882_v15  ;;  %v1990_v33 = vld [vmem:[%s2304_s2] ss:$0 sm:$0xff]  ;;  %vm190_vm6 = vcmask 64512   ;;  %s1885_s17 = smov 64   ;;  %s1886_s18 = smov 88   ;;  %vm317_vm9 = vcmask 1043456  }
   0xa   :  { %1627 = vmatpush3.bf16.msra.mxu1 %v1798_v14  ;;  %1652 = vmatprep.subr.bf16.mxu0 %v1882_v15  ;;  %v1997_v39 = vld [vmem:[%s2305_s3] ss:$0 sm:$0xff]  ;;  %s1884_s3 = smov 96   ;;  %s1888_s19 = smov 56  }
   0xb   :  { %1628 = vmatprep.subr.bf16.mxu1 %v1882_v15  ;;  %1654 = vmatprep.mubr.msk.bf16.mxu0 %vm1883_vm1, %v1882_v15  ;;  %v1533_v44 = vld [vmem:[%s2307_s5] ss:$0 sm:$0xff]  ;;  %s1889_s20 = smov 80   ;;  %s1890_s21 = smov 112  }
   0xc   :  { %v2038_v61 = vld [vmem:[%s2303_s1] sm:$0xff]  ;;  %s1891_s25 = smov 48   ;;  %s1892_s26 = smov 72  }
   0xd   :  { %vm177_vm7 = vcmp.eq.f32.partialorder %v2038_v61, 0.0  ;;  %s1893_s27 = smov 104   ;;  %s1894_s29 = smov 40  }
   0xe   :  { %1629 = vmatpush3.bf16.msra.mxu1 %v1799_v16 }
   0xf   :  { %1634 = vmatprep.subr.bf16.mxu1 %v1882_v15 }
  0x90   :  { %v52_v4 = vpop.xlane.xlu0 %51 }
  0x91   :  { %v57_v5 = vmul.f32 0.03125, %v52_v4  ;;  %v2047_v4 = vld [vmem:[%s2303_s1 + $0x8] sm:$0xff]  ;;  %s1887_s1 = smov 120  }
  0x92   :  { %vm178_vm8 = vcmp.eq.f32.partialorder %v2047_v4, 0.0 }
  0x93   :  { %v59_v6 = vsub.f32 %v43_v0, %v57_v5 }
  0x94   :  { %v55_v7 = vpop.xlane.xlu0 %54 }
  0x95   :  { %v58_v8 = vmul.f32 0.03125, %v55_v7  ;;  %v61_v9 = vmul.f32 %v59_v6, %v59_v6  ;;  %v95_v35 = vmul.f32 %v1990_v33, %v59_v6 }
  0x97   :  { %v60_v10 = vsub.f32 %v44_v1, %v58_v8  ;;  %v63_v11 = vsel %vm49_vm0, %v61_v9, 0.0 }
  0x98   :  { %64 = vadd.xlane.f32.xlu1 %v63_v11 }
  0x99   :  { %v62_v12 = vmul.f32 %v60_v10, %v60_v10  ;;  %v96_v36 = vmul.f32 %v1990_v33, %v60_v10 }
  0x9b   :  { %v66_v13 = vsel %vm49_vm0, %v62_v12, 0.0 }
  0x9c   :  { %67 = vadd.xlane.f32.xlu1 %v66_v13 }
 0x125   :  { %v65_v17 = vpop.xlane.xlu1 %64 }
 0x126   :  { %v69_v18 = vmul.f32 0.032258064, %v65_v17 }
 0x128   :  { %1810 = vrsqrt.f32 %v69_v18  ;;  %vm73_vm2 = vcmp.eq.f32.partialorder %v69_v18, inf  ;;  %v76_v23 = vand.u32 2147483648, %v69_v18  ;;  %vm75_vm3 = vcmp.eq.f32.partialorder %v69_v18, 0.0 }
 0x129   :  { %v68_v19 = vpop.xlane.xlu1 %67 }
 0x12a   :  { %v70_v20 = vmul.f32 0.032258064, %v68_v19 }
 0x12c   :  { %1812 = vrsqrt.f32 %v70_v20  ;;  %vm80_vm4 = vcmp.eq.f32.partialorder %v70_v20, inf  ;;  %v83_v29 = vand.u32 2147483648, %v70_v20  ;;  %vm82_vm5 = vcmp.eq.f32.partialorder %v70_v20, 0.0 }
 0x132   :  { %v1811_v21 = vpop.eup %1810 }
 0x133   :  { %v72_v22 = vmul.f32 %v1811_v21, %v69_v18 }
 0x135   :  { %v74_v24 = vsel %vm73_vm2, %v69_v18, %v72_v22 }
 0x136   :  { %v1813_v25 = vpop.eup %1812  ;;  %v77_v26 = vsel %vm75_vm3, %v76_v23, %v74_v24 }
 0x137   :  { %v85_v27 = vadd.f32 1e-06, %v77_v26  ;;  %v79_v28 = vmul.f32 %v1813_v25, %v70_v20 }
 0x139   :  { %1814 = vrcp.f32 %v85_v27  ;;  %v81_v30 = vsel %vm80_vm4, %v70_v20, %v79_v28 }
 0x13a   :  { %v84_v31 = vsel %vm82_vm5, %v83_v29, %v81_v30 }
 0x13b   :  { %v86_v32 = vadd.f32 1e-06, %v84_v31 }
 0x13d   :  { %1816 = vrcp.f32 %v86_v32 }
 0x143   :  { %v1815_v34 = vpop.eup %1814 }
 0x144   :  { %v97_v37 = vmul.f32 %v1815_v34, %v95_v35 }
 0x146   :  { %v2000_v41 = vadd.f32 %v1997_v39, %v97_v37 }
 0x147   :  { %v1817_v38 = vpop.eup %1816 }
 0x148   :  { %v98_v40 = vmul.f32 %v1817_v38, %v96_v36 }
 0x14a   :  { %v2003_v42 = vadd.f32 %v1997_v39, %v98_v40 }
 0x14c   :  { %v107_v43 = vpack.c.bf16 %v2003_v42, %v2000_v41 }
 0x14e   :  { %1631 = vmatmul.mubr.msk.bf16.vlgmr.msra.gmra.mrb[0].mxu1 %vm49_vm0, %v107_v43 }
 0x14f   :  { %1636 = vmatprep.mubr.msk.bf16.mxu1 %vm1883_vm1, %v1882_v15 }
 0x221   :  { %v168_v45 = vpop.f32.mrb[0].mxu1 }
 0x222   :  { %v169_v46 = vadd.f32 %v1533_v44, %v168_v45  ;;  %v1632_v47 = vpop.f32.mrb[1].mxu1 }
 0x223   :  { %v171_v48 = vpop.f32.mrb[2].mxu1 }
 0x224   :  { %v2013_v49 = vpack.c.bf16 %v169_v46, %v169_v46  ;;  %v172_v50 = vadd.f32 %v1533_v44, %v171_v48  ;;  %v1633_v51 = vpop.f32.mrb[3].mxu1  ;;  %v175_v55 = vmul.f32 0.35355338, %v169_v46 }
 0x226   :  { %v2015_v52 = vpack.c.bf16 %v172_v50, %v172_v50  ;;  %188 = vrot.lane.b32.xlu0 %v2013_v49, %s1884_s3  ;;  %v2021_v57 = vpack.c.bf16 %v175_v55, %v175_v55  ;;  %v176_v59 = vmul.f32 0.35355338, %v172_v50 }
 0x228   :  { %238 = vrot.lane.b32.xlu1 %v2015_v52, %s1884_s3  ;;  %v2029_v60 = vpack.c.bf16 %v176_v59, %v176_v59 }
 0x298   :  { %v189_v53 = vpop.permute.xlu0 %188 }
 0x299   :  { %v195_v54 = vsel %vm190_vm6, %v189_v53, 0 }
 0x29a   :  { %1635 = vmatpush3.bf16.xpose.msra.mxu1 %v195_v54  ;;  %v239_v56 = vpop.permute.xlu1 %238 }
 0x29b   :  { %1640 = vmatprep.subr.bf16.mxu1 %v1882_v15  ;;  %v244_v58 = vsel %vm190_vm6, %v239_v56, 0 }
 0x2a1   :  { %1637 = vmatmul.mubr.msk.bf16.vlgmr.msra.gmra.mrb[4].mxu1 %vm190_vm6, %v2021_v57 }
 0x2a2   :  { %1641 = vmatpush3.bf16.xpose.msra.mxu1 %v244_v58  ;;  %1642 = vmatprep.mubr.msk.bf16.mxu1 %vm1883_vm1, %v1882_v15 }
 0x2a3   :  { %1646 = vmatprep.subr.bf16.mxu1 %v1882_v15 }
 0x2a9   :  { %1643 = vmatmul.mubr.msk.bf16.vlgmr.msra.gmra.mrb[8].mxu1 %vm190_vm6, %v2029_v60 }
 0x2aa   :  { %1648 = vmatprep.mubr.msk.bf16.mxu1 %vm1883_vm1, %v1882_v15 }
 0x374   :  { %v231_v62 = vpop.f32.mrb[4].mxu1 }
 0x375   :  { %v286_v63 = vsel %vm177_vm7, -1e+09, %v231_v62  ;;  %v1638_v0 = vpop.f32.mrb[5].mxu1 }
 0x376   :  { %v234_v1 = vpop.f32.mrb[6].mxu1  ;;  %v288_v2 = vsel %vm190_vm6, %v286_v63, -inf }
 0x377   :  { %289 = vmax.xlane.f32.xlu1 %v288_v2  ;;  %v1639_v3 = vpop.f32.mrb[7].mxu1 }
 0x37c   :  { %v280_v5 = vpop.f32.mrb[8].mxu1 }
 0x37d   :  { %v287_v6 = vsel %vm178_vm8, -1e+09, %v280_v5  ;;  %v1644_v7 = vpop.f32.mrb[9].mxu1 }
 0x37e   :  { %v283_v8 = vpop.f32.mrb[10].mxu1  ;;  %v291_v9 = vsel %vm190_vm6, %v287_v6, -inf }
 0x37f   :  { %292 = vmax.xlane.f32.xlu0 %v291_v9  ;;  %v1645_v10 = vpop.f32.mrb[11].mxu1 }
 0x388   :  { %361 = vrot.lane.b32.xlu1 %v2015_v52, %s1885_s17 }
 0x38c   :  { %413 = vrot.lane.b32.xlu1 %v2013_v49, %s1886_s18 }
 0x404   :  { %v290_v11 = vpop.xlane.xlu1 %289 }
 0x405   :  { %v294_v12 = vsub.f32 %v286_v63, %v290_v11 }
 0x407   :  { %v296_v13 = vmul.f32 1.442695, %v294_v12 }
 0x408   :  { %v362_v14 = vpop.permute.xlu1 %361 }
 0x409   :  { %1818 = vpow2.f32 %v296_v13  ;;  %v367_v16 = vsel %vm317_vm9, %v362_v14, 0 }
 0x40a   :  { %1653 = vmatpush3.bf16.msra.mxu0 %v367_v16 }
 0x40b   :  { %1664 = vmatprep.subr.bf16.mxu0 %v1882_v15 }
 0x40c   :  { %v293_v17 = vpop.xlane.xlu0 %292  ;;  %v414_v25 = vpop.permute.xlu1 %413 }
 0x40d   :  { %v295_v18 = vsub.f32 %v287_v6, %v293_v17  ;;  %v419_v32 = vsel %vm190_vm6, %v414_v25, 0 }
 0x40f   :  { %v298_v19 = vmul.f32 1.442695, %v295_v18 }
 0x411   :  { %1820 = vpow2.f32 %v298_v19 }
 0x413   :  { %v1819_v20 = vpop.eup %1818 }
 0x414   :  { %v300_v21 = vsel %vm190_vm6, %v1819_v20, 0.0 }
 0x415   :  { %301 = vadd.xlane.f32.xlu0 %v300_v21 }
 0x41b   :  { %v1821_v22 = vpop.eup %1820 }
 0x41c   :  { %v303_v23 = vsel %vm190_vm6, %v1821_v22, 0.0 }
 0x41d   :  { %304 = vadd.xlane.f32.xlu1 %v303_v23 }
 0x42b   :  { %312 = vrot.lane.b32.xlu0 %v2013_v49, %s1885_s17 }
 0x42e   :  { %464 = vrot.lane.b32.xlu1 %v2015_v52, %s1886_s18 }
 0x42f   :  { %411 = vrot.lane.b32.xlu0 %v2021_v57, %s1887_s1 }
 0x432   :  { %462 = vrot.lane.b32.xlu1 %v2029_v60, %s1887_s1 }
 0x4a2   :  { %v302_v24 = vpop.xlane.xlu0 %301 }
 0x4a3   :  { %1822 = vrcp.f32 %v302_v24 }
 0x4a6   :  { %v313_v26 = vpop.permute.xlu0 %312 }
 0x4a7   :  { %v319_v27 = vsel %vm317_vm9, %v313_v26, 0 }
 0x4a8   :  { %1647 = vmatpush3.bf16.msra.mxu1 %v319_v27 }
 0x4a9   :  { %1658 = vmatprep.subr.bf16.mxu1 %v1882_v15 }
 0x4aa   :  { %v305_v28 = vpop.xlane.xlu1 %304  ;;  %v412_v38 = vpop.permute.xlu0 %411 }
 0x4ab   :  { %1824 = vrcp.f32 %v305_v28  ;;  %v179_v28 = vld [vmem:[%s2308_s6] sm:$0xf] }
 0x4ad   :  { %v1823_v29 = vpop.eup %1822 }
 0x4ae   :  { %v308_v30 = vmul.f32 %v1823_v29, %v1819_v20  ;;  %v465_v36 = vpop.permute.xlu1 %464 }
 0x4af   :  { %v470_v40 = vsel %vm190_vm6, %v465_v36, 0 }
 0x4b0   :  { %v310_v31 = vpack.c.bf16 %v308_v30, %v308_v30 }
 0x4b2   :  { %1649 = vmatmul.mubr.msk.bf16.vlgmr.msra.gmra.mrb[12].mxu1 %vm190_vm6, %v310_v31  ;;  %v463_v43 = vpop.permute.xlu1 %462  ;;  %v686_v31 = vsel %vm317_vm9, %v179_v28, 0 }
 0x4b3   :  { %1659 = vmatpush3.bf16.xpose.msra.mxu1 %v419_v32  ;;  %1660 = vmatprep.mubr.msk.bf16.mxu1 %vm1883_vm1, %v1882_v15 }
 0x4b4   :  { %1670 = vmatprep.subr.bf16.mxu1 %v1882_v15 }
 0x4b5   :  { %v1825_v34 = vpop.eup %1824 }
 0x4b6   :  { %v309_v35 = vmul.f32 %v1825_v34, %v1821_v22 }
 0x4b8   :  { %v311_v37 = vpack.c.bf16 %v309_v35, %v309_v35 }
 0x4ba   :  { %1655 = vmatmul.mubr.msk.bf16.vlgmr.msra.gmra.mrb[0].mxu0 %vm190_vm6, %v311_v37  ;;  %1661 = vmatmul.mubr.msk.bf16.vlgmr.msra.gmra.mrb[16].mxu1 %vm190_vm6, %v412_v38  ;;  %v180_v37 = vld [vmem:[%s2308_s6 + $0x4] sm:$0xf] }
 0x4bb   :  { %1665 = vmatpush3.bf16.xpose.msra.mxu0 %v470_v40  ;;  %1666 = vmatprep.mubr.msk.bf16.mxu0 %vm1883_vm1, %v1882_v15  ;;  %v639_v38 = vsel %vm317_vm9, %v180_v37, 0 }
 0x4bc   :  { %1676 = vmatprep.subr.bf16.mxu0 %v1882_v15  ;;  %1672 = vmatprep.mubr.msk.bf16.mxu1 %vm1883_vm1, %v1882_v15 }
 0x4c2   :  { %1667 = vmatmul.mubr.msk.bf16.vlgmr.msra.gmra.mrb[4].mxu0 %vm190_vm6, %v463_v43 }
 0x4c3   :  { %1678 = vmatprep.mubr.msk.bf16.mxu0 %vm1883_vm1, %v1882_v15 }
 0x585   :  { %v2081_v44 = vpop.f32.mrb[12].mxu1 }
 0x586   :  { %v1650_v45 = vpop.f32.mrb[13].mxu1 }
 0x587   :  { %v358_v46 = vpop.f32.mrb[14].mxu1 }
 0x588   :  { %v1651_v47 = vpop.f32.mrb[15].mxu1 }
 0x58d   :  { %v2083_v48 = vpop.f32.mrb[0].mxu0  ;;  %v455_v50 = vpop.f32.mrb[16].mxu1 }
 0x58e   :  { %v409_v51 = vpack.c.bf16 %v2083_v48, %v2081_v44  ;;  %v512_v53 = vsel %vm177_vm7, -1e+09, %v455_v50  ;;  %v1656_v54 = vpop.f32.mrb[1].mxu0  ;;  %v1662_v55 = vpop.f32.mrb[17].mxu1 }
 0x58f   :  { %v406_v56 = vpop.f32.mrb[2].mxu0  ;;  %v458_v58 = vpop.f32.mrb[18].mxu1  ;;  %v514_v59 = vsel %vm190_vm6, %v512_v53, -inf }
 0x590   :  { %v1657_v62 = vpop.f32.mrb[3].mxu0  ;;  %515 = vmax.xlane.f32.xlu0 %v514_v59  ;;  %v1663_v63 = vpop.f32.mrb[19].mxu1 }
 0x595   :  { %v506_v0 = vpop.f32.mrb[4].mxu0 }
 0x596   :  { %v513_v1 = vsel %vm178_vm8, -1e+09, %v506_v0  ;;  %v1668_v2 = vpop.f32.mrb[5].mxu0 }
 0x597   :  { %v509_v3 = vpop.f32.mrb[6].mxu0  ;;  %v517_v5 = vsel %vm190_vm6, %v513_v1, -inf }
 0x598   :  { %518 = vmax.xlane.f32.xlu1 %v517_v5  ;;  %v1669_v6 = vpop.f32.mrb[7].mxu0 }
 0x5a9   :  { %586 = vrot.lane.b32.xlu1 %v2015_v52, %s1888_s19 }
 0x5ad   :  { %731 = vrot.lane.b32.xlu1 %v2013_v49, %s1889_s20 }
 0x5b1   :  { %781 = vrot.lane.b32.xlu1 %v2015_v52, %s1889_s20 }
 0x5b5   :  { %779 = vrot.lane.b32.xlu1 %v2029_v60, %s1890_s21 }
 0x61d   :  { %v516_v7 = vpop.xlane.xlu0 %515 }
 0x61e   :  { %v520_v8 = vsub.f32 %v512_v53, %v516_v7 }
 0x620   :  { %v522_v9 = vmul.f32 1.442695, %v520_v8 }
 0x622   :  { %1826 = vpow2.f32 %v522_v9 }
 0x625   :  { %v519_v10 = vpop.xlane.xlu1 %518 }
 0x626   :  { %v521_v11 = vsub.f32 %v513_v1, %v519_v10 }
 0x628   :  { %v524_v12 = vmul.f32 1.442695, %v521_v11 }
 0x629   :  { %v587_v13 = vpop.permute.xlu1 %586 }
 0x62a   :  { %1828 = vpow2.f32 %v524_v12  ;;  %v592_v14 = vsel %vm317_vm9, %v587_v13, 0 }
 0x62b   :  { %1677 = vmatpush3.bf16.msra.mxu0 %v592_v14 }
 0x62c   :  { %v1827_v16 = vpop.eup %1826  ;;  %1688 = vmatprep.subr.bf16.mxu0 %v1882_v15 }
 0x62d   :  { %v526_v17 = vsel %vm190_vm6, %v1827_v16, 0.0  ;;  %v732_v32 = vpop.permute.xlu1 %731 }
 0x62e   :  { %527 = vadd.xlane.f32.xlu0 %v526_v17 }
 0x631   :  { %v782_v34 = vpop.permute.xlu1 %781 }
 0x632   :  { %v787_v35 = vsel %vm190_vm6, %v782_v34, 0 }
 0x634   :  { %v1829_v18 = vpop.eup %1828 }
 0x635   :  { %v529_v19 = vsel %vm190_vm6, %v1829_v18, 0.0  ;;  %v780_v36 = vpop.permute.xlu1 %779 }
 0x636   :  { %530 = vadd.xlane.f32.xlu0 %v529_v19 }
 0x64c   :  { %538 = vrot.lane.b32.xlu0 %v2013_v49, %s1888_s19 }
 0x650   :  { %729 = vrot.lane.b32.xlu0 %v2021_v57, %s1890_s21 }
 0x6bb   :  { %v528_v20 = vpop.xlane.xlu0 %527 }
 0x6bc   :  { %1830 = vrcp.f32 %v528_v20 }
 0x6c3   :  { %v531_v21 = vpop.xlane.xlu0 %530 }
 0x6c4   :  { %1832 = vrcp.f32 %v531_v21 }
 0x6c6   :  { %v1831_v22 = vpop.eup %1830 }
 0x6c7   :  { %v534_v23 = vmul.f32 %v1831_v22, %v1827_v16  ;;  %v539_v24 = vpop.permute.xlu0 %538 }
 0x6c8   :  { %v544_v25 = vsel %vm317_vm9, %v539_v24, 0 }
 0x6c9   :  { %1671 = vmatpush3.bf16.msra.mxu1 %v544_v25  ;;  %v536_v26 = vpack.c.bf16 %v534_v23, %v534_v23 }
 0x6ca   :  { %1682 = vmatprep.subr.bf16.mxu1 %v1882_v15 }
 0x6cb   :  { %v730_v56 = vpop.permute.xlu0 %729 }
 0x6cc   :  { %1673 = vmatmul.mubr.msk.bf16.vlgmr.msra.gmra.mrb[20].mxu1 %vm190_vm6, %v536_v26 }
 0x6cd   :  { %1684 = vmatprep.mubr.msk.bf16.mxu1 %vm1883_vm1, %v1882_v15  ;;  %1683 = vmatpush3.bf16.msra.mxu1 %v639_v38 }
 0x6ce   :  { %v1833_v27 = vpop.eup %1832  ;;  %1694 = vmatprep.subr.bf16.mxu1 %v1882_v15 }
 0x6cf   :  { %v535_v29 = vmul.f32 %v1833_v27, %v1829_v18 }
 0x6d1   :  { %v537_v30 = vpack.c.bf16 %v535_v29, %v535_v29 }
 0x6d3   :  { %1679 = vmatmul.mubr.msk.bf16.vlgmr.msra.gmra.mrb[8].mxu0 %vm190_vm6, %v537_v30 }
 0x6d4   :  { %1689 = vmatpush3.bf16.msra.mxu0 %v686_v31  ;;  %1690 = vmatprep.mubr.msk.bf16.mxu0 %vm1883_vm1, %v1882_v15 }
 0x6d5   :  { %1700 = vmatprep.subr.bf16.mxu0 %v1882_v15 }
 0x6db   :  { %1691 = vmatmul.mubr.msk.bf16.vlgmr.msra.gmra.mrb[12].mxu0 %vm190_vm6, %v409_v51  ;;  %v737_v51 = vsel %vm190_vm6, %v732_v32, 0 }
 0x6dc   :  { %1702 = vmatprep.mubr.msk.bf16.mxu0 %vm1883_vm1, %v1882_v15 }
 0x6dd   :  { %1701 = vmatpush3.bf16.xpose.msra.mxu0 %v787_v35 }
 0x6de   :  { %1712 = vmatprep.subr.bf16.mxu0 %v1882_v15 }
 0x6e4   :  { %1703 = vmatmul.mubr.msk.bf16.vlgmr.msra.gmra.mrb[16].mxu0 %vm190_vm6, %v780_v36 }
 0x6e5   :  { %1714 = vmatprep.mubr.msk.bf16.mxu0 %vm1883_vm1, %v1882_v15 }
 0x79f   :  { %v580_v40 = vpop.f32.mrb[20].mxu1 }
 0x7a0   :  { %v1674_v43 = vpop.f32.mrb[21].mxu1 }
 0x7a1   :  { %v583_v44 = vpop.f32.mrb[22].mxu1 }
 0x7a2   :  { %v1675_v45 = vpop.f32.mrb[23].mxu1 }
 0x7a6   :  { %v628_v46 = vpop.f32.mrb[8].mxu0 }
 0x7a7   :  { %v634_v47 = vpack.c.bf16 %v628_v46, %v580_v40  ;;  %v1680_v48 = vpop.f32.mrb[9].mxu0 }
 0x7a8   :  { %v631_v50 = vpop.f32.mrb[10].mxu0 }
 0x7a9   :  { %v1681_v53 = vpop.f32.mrb[11].mxu0  ;;  %1685 = vmatmul.mubr.msk.bf16.vlgmr.msra.gmra.mrb[24].mxu1 %vm190_vm6, %v634_v47  ;;  %v181_v50 = vld [vmem:[%s2308_s6 + $0x8] sm:$0xf] }
 0x7aa   :  { %1695 = vmatpush3.bf16.xpose.msra.mxu1 %v737_v51  ;;  %1696 = vmatprep.mubr.msk.bf16.mxu1 %vm1883_vm1, %v1882_v15  ;;  %v956_v51 = vsel %vm317_vm9, %v181_v50, 0 }
 0x7ab   :  { %1706 = vmatprep.subr.bf16.mxu1 %v1882_v15 }
 0x7ae   :  { %v722_v54 = vpop.f32.mrb[12].mxu0 }
 0x7af   :  { %v1692_v55 = vpop.f32.mrb[13].mxu0 }
 0x7b0   :  { %v725_v58 = vpop.f32.mrb[14].mxu0 }
 0x7b1   :  { %v1693_v59 = vpop.f32.mrb[15].mxu0  ;;  %1697 = vmatmul.mubr.msk.bf16.vlgmr.msra.gmra.mrb[28].mxu1 %vm190_vm6, %v730_v56 }
 0x7b2   :  { %1708 = vmatprep.mubr.msk.bf16.mxu1 %vm1883_vm1, %v1882_v15 }
 0x7b7   :  { %v823_v62 = vpop.f32.mrb[16].mxu0 }
 0x7b8   :  { %v830_v63 = vsel %vm178_vm8, -1e+09, %v823_v62  ;;  %v1704_v0 = vpop.f32.mrb[17].mxu0 }
 0x7b9   :  { %v826_v1 = vpop.f32.mrb[18].mxu0  ;;  %v834_v2 = vsel %vm190_vm6, %v830_v63, -inf }
 0x7ba   :  { %835 = vmax.xlane.f32.xlu1 %v834_v2  ;;  %v1705_v3 = vpop.f32.mrb[19].mxu0 }
 0x7cb   :  { %903 = vrot.lane.b32.xlu1 %v2015_v52, %s1891_s25 }
 0x7cf   :  { %1003 = vrot.lane.b32.xlu1 %v2013_v49, %s1892_s26 }
 0x7d3   :  { %1053 = vrot.lane.b32.xlu1 %v2015_v52, %s1892_s26 }
 0x7d7   :  { %1051 = vrot.lane.b32.xlu1 %v2029_v60, %s1893_s27 }
 0x847   :  { %v836_v5 = vpop.xlane.xlu1 %835 }
 0x848   :  { %v838_v8 = vsub.f32 %v830_v63, %v836_v5 }
 0x84a   :  { %v841_v9 = vmul.f32 1.442695, %v838_v8 }
 0x84b   :  { %v904_v6 = vpop.permute.xlu1 %903 }
 0x84c   :  { %v909_v7 = vsel %vm317_vm9, %v904_v6, 0  ;;  %1834 = vpow2.f32 %v841_v9 }
 0x84d   :  { %1713 = vmatpush3.bf16.msra.mxu0 %v909_v7 }
 0x84e   :  { %1724 = vmatprep.subr.bf16.mxu0 %v1882_v15 }
 0x84f   :  { %v1004_v32 = vpop.permute.xlu1 %1003 }
 0x850   :  { %v1009_v35 = vsel %vm190_vm6, %v1004_v32, 0 }
 0x853   :  { %v1054_v62 = vpop.permute.xlu1 %1053 }
 0x854   :  { %v1059_v3 = vsel %vm190_vm6, %v1054_v62, 0 }
 0x856   :  { %v1835_v21 = vpop.eup %1834 }
 0x857   :  { %v846_v23 = vsel %vm190_vm6, %v1835_v21, 0.0  ;;  %v1052_v61 = vpop.permute.xlu1 %1051 }
 0x87c   :  { %v675_v10 = vpop.f32.mrb[24].mxu1 }
 0x87d   :  { %v2151_v11 = vadd.f32 %v722_v54, %v675_v10  ;;  %v1686_v12 = vpop.f32.mrb[25].mxu1 }
 0x87e   :  { %v678_v13 = vpop.f32.mrb[26].mxu1 }
 0x87f   :  { %v2153_v14 = vadd.f32 %v725_v58, %v678_v13  ;;  %v1687_v16 = vpop.f32.mrb[27].mxu1 }
 0x884   :  { %v773_v17 = vpop.f32.mrb[28].mxu1 }
 0x885   :  { %v829_v60 = vsel %vm177_vm7, -1e+09, %v773_v17  ;;  %v1698_v18 = vpop.f32.mrb[29].mxu1 }
 0x886   :  { %v776_v19 = vpop.f32.mrb[30].mxu1  ;;  %v831_v20 = vsel %vm190_vm6, %v829_v60, -inf }
 0x887   :  { %832 = vmax.xlane.f32.xlu0 %v831_v20  ;;  %v1699_v22 = vpop.f32.mrb[31].mxu1 }
 0x88b   :  { %847 = vadd.xlane.f32.xlu0 %v846_v23 }
 0x914   :  { %v833_v24 = vpop.xlane.xlu0 %832 }
 0x915   :  { %v837_v25 = vsub.f32 %v829_v60, %v833_v24 }
 0x917   :  { %v839_v26 = vmul.f32 1.442695, %v837_v25 }
 0x918   :  { %v848_v27 = vpop.xlane.xlu0 %847 }
 0x919   :  { %1836 = vpow2.f32 %v839_v26 }
 0x91a   :  { %1838 = vrcp.f32 %v848_v27 }
 0x923   :  { %v1837_v28 = vpop.eup %1836 }
 0x924   :  { %v1839_v29 = vpop.eup %1838  ;;  %v843_v30 = vsel %vm190_vm6, %v1837_v28, 0.0 }
 0x925   :  { %v852_v31 = vmul.f32 %v1839_v29, %v1835_v21  ;;  %844 = vadd.xlane.f32.xlu0 %v843_v30 }
 0x927   :  { %v854_v34 = vpack.c.bf16 %v852_v31, %v852_v31 }
 0x929   :  { %1715 = vmatmul.mubr.msk.bf16.vlgmr.msra.gmra.mrb[20].mxu0 %vm190_vm6, %v854_v34 }
 0x92a   :  { %1725 = vmatpush3.bf16.xpose.msra.mxu0 %v1009_v35  ;;  %1726 = vmatprep.mubr.msk.bf16.mxu0 %vm1883_vm1, %v1882_v15 }
 0x92b   :  { %1736 = vmatprep.subr.bf16.mxu0 %v1882_v15 }
 0x93b   :  { %855 = vrot.lane.b32.xlu0 %v2013_v49, %s1891_s25 }
 0x93f   :  { %1001 = vrot.lane.b32.xlu0 %v2021_v57, %s1893_s27 }
 0x9b2   :  { %v845_v36 = vpop.xlane.xlu0 %844 }
 0x9b3   :  { %1840 = vrcp.f32 %v845_v36 }
 0x9b6   :  { %v856_v37 = vpop.permute.xlu0 %855 }
 0x9b7   :  { %v861_v38 = vsel %vm317_vm9, %v856_v37, 0 }
 0x9b8   :  { %1707 = vmatpush3.bf16.msra.mxu1 %v861_v38  ;;  %v182_v38 = vld [vmem:[%s2308_s6 + $0xc] sm:$0xf] }
 0x9b9   :  { %1718 = vmatprep.subr.bf16.mxu1 %v1882_v15 }
 0x9ba   :  { %v1002_v40 = vpop.permute.xlu0 %1001 }
 0x9bb   :  { %1727 = vmatmul.mubr.msk.bf16.vlgmr.msra.gmra.mrb[24].mxu0 %vm190_vm6, %v1002_v40  ;;  %v1228_v40 = vsel %vm317_vm9, %v182_v38, 0 }
 0x9bc   :  { %1738 = vmatprep.mubr.msk.bf16.mxu0 %vm1883_vm1, %v1882_v15 }
 0x9bd   :  { %v1841_v43 = vpop.eup %1840 }
 0x9be   :  { %v851_v44 = vmul.f32 %v1841_v43, %v1837_v28 }
 0x9c0   :  { %v853_v45 = vpack.c.bf16 %v851_v44, %v851_v44 }
 0x9c2   :  { %1709 = vmatmul.mubr.msk.bf16.vlgmr.msra.gmra.mrb[32].mxu1 %vm190_vm6, %v853_v45 }
 0x9c3   :  { %1720 = vmatprep.mubr.msk.bf16.mxu1 %vm1883_vm1, %v1882_v15  ;;  %1719 = vmatpush3.bf16.msra.mxu1 %v956_v51 }
 0x9c4   :  { %1730 = vmatprep.subr.bf16.mxu1 %v1882_v15 }
 0x9fc   :  { %v945_v57 = vpop.f32.mrb[20].mxu0 }
 0x9fd   :  { %v1716_v46 = vpop.f32.mrb[21].mxu0 }
 0x9fe   :  { %v948_v47 = vpop.f32.mrb[22].mxu0 }
 0x9ff   :  { %v1717_v48 = vpop.f32.mrb[23].mxu0 }
 0xa8e   :  { %v1045_v53 = vpop.f32.mrb[24].mxu0 }
 0xa8f   :  { %v1101_v54 = vsel %vm177_vm7, -1e+09, %v1045_v53  ;;  %v1728_v55 = vpop.f32.mrb[25].mxu0 }
 0xa90   :  { %v1048_v56 = vpop.f32.mrb[26].mxu0  ;;  %v1103_v58 = vsel %vm190_vm6, %v1101_v54, -inf }
 0xa91   :  { %1104 = vmax.xlane.f32.xlu0 %v1103_v58  ;;  %v1729_v59 = vpop.f32.mrb[27].mxu0 }
 0xa95   :  { %v897_v63 = vpop.f32.mrb[32].mxu1 }
 0xa96   :  { %v951_v0 = vpack.c.bf16 %v945_v57, %v897_v63  ;;  %v1710_v1 = vpop.f32.mrb[33].mxu1 }
 0xa97   :  { %v900_v2 = vpop.f32.mrb[34].mxu1 }
 0xa98   :  { %v1711_v5 = vpop.f32.mrb[35].mxu1  ;;  %1721 = vmatmul.mubr.msk.bf16.vlgmr.msra.gmra.mrb[36].mxu1 %vm190_vm6, %v951_v0 }
 0xa99   :  { %1731 = vmatpush3.bf16.xpose.msra.mxu1 %v1059_v3  ;;  %1732 = vmatprep.mubr.msk.bf16.mxu1 %vm1883_vm1, %v1882_v15 }
 0xa9a   :  { %1742 = vmatprep.subr.bf16.mxu1 %v1882_v15 }
 0xaa0   :  { %1733 = vmatmul.mubr.msk.bf16.vlgmr.msra.gmra.mrb[40].mxu1 %vm190_vm6, %v1052_v61 }
 0xaa1   :  { %1744 = vmatprep.mubr.msk.bf16.mxu1 %vm1883_vm1, %v1882_v15 }
 0xb1e   :  { %v1105_v6 = vpop.xlane.xlu0 %1104 }
 0xb1f   :  { %v1109_v7 = vsub.f32 %v1101_v54, %v1105_v6  ;;  %v1557_v54 = vld [vmem:[%s2309_s7] ss:$0 sm:$0xff] }
 0xb21   :  { %v1111_v8 = vmul.f32 1.442695, %v1109_v7 }
 0xb23   :  { %1842 = vpow2.f32 %v1111_v8 }
 0xb2d   :  { %v1843_v9 = vpop.eup %1842 }
 0xb2e   :  { %v1115_v10 = vsel %vm190_vm6, %v1843_v9, 0.0 }
 0xb2f   :  { %1116 = vadd.xlane.f32.xlu0 %v1115_v10 }
 0xb6b   :  { %v992_v12 = vpop.f32.mrb[36].mxu1 }
 0xb6c   :  { %v999_v13 = vadd.f32 %v992_v12, %v2151_v11  ;;  %v1722_v16 = vpop.f32.mrb[37].mxu1 }
 0xb6d   :  { %v995_v17 = vpop.f32.mrb[38].mxu1  ;;  %v1800_v16 = vld [vmem:[%s2310_s8] sm:$0xff]  }
 0xb6e   :  { %v1000_v60 = vadd.f32 %v995_v17, %v2153_v14  ;;  %v1723_v18 = vpop.f32.mrb[39].mxu1  ;;  %v1801_v17 = vld [vmem:[%s2310_s8 + $0x8] sm:$0xff]  }
 0xb6f   :  { %v1803_v18 = vld [vmem:[%s2312_s10 + $0x8] sm:$0xff]  }
 0xb73   :  { %v1095_v19 = vpop.f32.mrb[40].mxu1 }
 0xb74   :  { %v1102_v20 = vsel %vm178_vm8, -1e+09, %v1095_v19  ;;  %v1734_v21 = vpop.f32.mrb[41].mxu1  ;;  %v1804_v19 = vld [vmem:[%s2312_s10 + $0x10] sm:$0xff]  }
 0xb75   :  { %v1098_v22 = vpop.f32.mrb[42].mxu1  ;;  %v1106_v23 = vsel %vm190_vm6, %v1102_v20, -inf  ;;  %v1806_v21 = vld [vmem:[%s2312_s10 + $0x20] sm:$0xff]  }
 0xb76   :  { %1107 = vmax.xlane.f32.xlu1 %v1106_v23  ;;  %v1735_v24 = vpop.f32.mrb[43].mxu1  ;;  %v1807_v22 = vld [vmem:[%s2312_s10 + $0x28] sm:$0xff]  }
 0xb87   :  { %1175 = vrot.lane.b32.xlu1 %v2015_v52, %s1894_s29 }
 0xbbc   :  { %v1117_v29 = vpop.xlane.xlu0 %1116 }
 0xc03   :  { %v1108_v25 = vpop.xlane.xlu1 %1107 }
 0xc04   :  { %v1110_v11 = vsub.f32 %v1102_v20, %v1108_v25  ;;  %v1805_v20 = vld [vmem:[%s2312_s10 + $0x18] sm:$0xff]  }
 0xc06   :  { %v1113_v26 = vmul.f32 1.442695, %v1110_v11 }
 0xc07   :  { %v1176_v27 = vpop.permute.xlu1 %1175 }
 0xc08   :  { %1844 = vpow2.f32 %v1113_v26  ;;  %v1181_v14 = vsel %vm317_vm9, %v1176_v27, 0 }
 0xc09   :  { %1743 = vmatpush3.bf16.msra.mxu1 %v1181_v14  ;;  %1846 = vrcp.f32 %v1117_v29 }
 0xc0a   :  { %1754 = vmatprep.subr.bf16.mxu1 %v1882_v15 }
 0xc12   :  { %v1845_v4 = vpop.eup %1844 }
 0xc13   :  { %v1118_v28 = vsel %vm190_vm6, %v1845_v4, 0.0  ;;  %v1847_v30 = vpop.eup %1846 }
 0xc14   :  { %1119 = vadd.xlane.f32.xlu0 %v1118_v28  ;;  %v1123_v31 = vmul.f32 %v1847_v30, %v1843_v9 }
 0xc16   :  { %v1125_v35 = vpack.c.bf16 %v1123_v31, %v1123_v31 }
 0xc2a   :  { %1127 = vrot.lane.b32.xlu0 %v2013_v49, %s1894_s29 }
 0xca1   :  { %v1120_v52 = vpop.xlane.xlu0 %1119 }
 0xca2   :  { %1848 = vrcp.f32 %v1120_v52 }
 0xca5   :  { %v1128_v32 = vpop.permute.xlu0 %1127 }
 0xca6   :  { %v1133_v34 = vsel %vm317_vm9, %v1128_v32, 0 }
 0xca7   :  { %1737 = vmatpush3.bf16.msra.mxu0 %v1133_v34 }
 0xca8   :  { %1748 = vmatprep.subr.bf16.mxu0 %v1882_v15 }
 0xcaa   :  { %1739 = vmatmul.mubr.msk.bf16.vlgmr.msra.gmra.mrb[28].mxu0 %vm190_vm6, %v1125_v35 }
 0xcab   :  { %1750 = vmatprep.mubr.msk.bf16.mxu0 %vm1883_vm1, %v1882_v15  ;;  %1749 = vmatpush3.bf16.msra.mxu0 %v1228_v40 }
 0xcac   :  { %v1849_v36 = vpop.eup %1848  ;;  %1762 = vmatprep.subr.bf16.mxu0 %v1882_v15 }
 0xcad   :  { %v1124_v49 = vmul.f32 %v1849_v36, %v1845_v4 }
 0xcaf   :  { %v1126_v37 = vpack.c.bf16 %v1124_v49, %v1124_v49 }
 0xcb1   :  { %1745 = vmatmul.mubr.msk.bf16.vlgmr.msra.gmra.mrb[44].mxu1 %vm190_vm6, %v1126_v37 }
 0xcb2   :  { %1758 = vmatprep.mubr.msk.bf16.mxu1 %vm1883_vm1, %v1882_v15  ;;  %1755 = vmatpush3.bf16.msra.mxu1 %v1800_v16 }
 0xcb3   :  { %1756 = vmatprep.subr.bf16.mxu1 %v1882_v15 }
 0xcb6   :  { %1757 = vmatpush3.bf16.msra.mxu1 %v1801_v17 }
 0xd7d   :  { %v1169_v43 = vpop.f32.mrb[28].mxu0 }
 0xd7e   :  { %v1740_v44 = vpop.f32.mrb[29].mxu0 }
 0xd7f   :  { %v1172_v45 = vpop.f32.mrb[30].mxu0 }
 0xd80   :  { %v1741_v57 = vpop.f32.mrb[31].mxu0 }
 0xd84   :  { %v1217_v46 = vpop.f32.mrb[44].mxu1 }
 0xd85   :  { %v1223_v47 = vpack.c.bf16 %v1217_v46, %v1169_v43  ;;  %v1746_v48 = vpop.f32.mrb[45].mxu1  ;;  %v1808_v46 = vld [vmem:[%s2312_s10 + $0x30] sm:$0xff]  }
 0xd86   :  { %v1220_v50 = vpop.f32.mrb[46].mxu1 }
 0xd87   :  { %v1747_v51 = vpop.f32.mrb[47].mxu1  ;;  %1751 = vmatmul.mubr.msk.bf16.vlgmr.msra.gmra.mrb[32].mxu0 %vm190_vm6, %v1223_v47  ;;  %v1558_v47 = vld [vmem:[%s2311_s9] ss:$0 sm:$0xff] }
 0xd88   :  { %1778 = vmatprep.mubr.msk.bf16.mxu0 %vm1883_vm1, %v1882_v15 }
 0xe5a   :  { %v1264_v53 = vpop.f32.mrb[32].mxu0 }
 0xe5b   :  { %v1271_v55 = vadd.f32 %v1264_v53, %v999_v13  ;;  %v1752_v56 = vpop.f32.mrb[33].mxu0 }
 0xe5c   :  { %v1267_v58 = vpop.f32.mrb[34].mxu0 }
 0xe5d   :  { %v1280_v59 = vadd.f32 %v1557_v54, %v1271_v55  ;;  %v1272_v62 = vadd.f32 %v1267_v58, %v1000_v60  ;;  %v1753_v63 = vpop.f32.mrb[35].mxu0  ;;  %v1802_v60 = vld [vmem:[%s2312_s10] sm:$0xff]  }
 0xe5e   :  { %1763 = vmatpush3.bf16.msra.mxu0 %v1802_v60 }
 0xe5f   :  { %v2224_v0 = vadd.f32 %v1280_v59, %v2000_v41  ;;  %v1281_v1 = vadd.f32 %v1557_v54, %v1272_v62  ;;  %1764 = vmatprep.subr.bf16.mxu0 %v1882_v15 }
 0xe61   :  { %v2227_v2 = vadd.f32 %v1281_v1, %v2003_v42  ;;  %v1284_v3 = vsel %vm49_vm0, %v2224_v0, 0.0 }
 0xe62   :  { %1285 = vadd.xlane.f32.xlu1 %v1284_v3  ;;  %1765 = vmatpush3.bf16.msra.mxu0 %v1803_v18 }
 0xe63   :  { %v1287_v5 = vsel %vm49_vm0, %v2227_v2, 0.0  ;;  %1766 = vmatprep.subr.bf16.mxu0 %v1882_v15 }
 0xe64   :  { %1288 = vadd.xlane.f32.xlu0 %v1287_v5 }
 0xe66   :  { %1767 = vmatpush3.bf16.msra.mxu0 %v1804_v19 }
 0xe67   :  { %1768 = vmatprep.subr.bf16.mxu0 %v1882_v15 }
 0xe6a   :  { %1769 = vmatpush3.bf16.msra.mxu0 %v1805_v20 }
 0xe6b   :  { %1770 = vmatprep.subr.bf16.mxu0 %v1882_v15 }
 0xe6e   :  { %1771 = vmatpush3.bf16.msra.mxu0 %v1806_v21 }
 0xe6f   :  { %1772 = vmatprep.subr.bf16.mxu0 %v1882_v15 }
 0xe72   :  { %1773 = vmatpush3.bf16.msra.mxu0 %v1807_v22 }
 0xe73   :  { %1774 = vmatprep.subr.bf16.mxu0 %v1882_v15 }
 0xe76   :  { %1775 = vmatpush3.bf16.msra.mxu0 %v1808_v46 }
 0xe77   :  { %1776 = vmatprep.subr.bf16.mxu0 %v1882_v15  ;;  %v1562_v15 = vld [vmem:[%s2313_s11] ss:$0 sm:$0xff] }
 0xeef   :  { %v1286_v61 = vpop.xlane.xlu1 %1285 }
 0xef0   :  { %v1290_v6 = vmul.f32 0.03125, %v1286_v61 }
 0xef1   :  { %v1289_v7 = vpop.xlane.xlu0 %1288 }
 0xef2   :  { %v1292_v8 = vsub.f32 %v2224_v0, %v1290_v6  ;;  %v1291_v9 = vmul.f32 0.03125, %v1289_v7 }
 0xef4   :  { %v1293_v41 = vsub.f32 %v2227_v2, %v1291_v9  ;;  %v1294_v10 = vmul.f32 %v1292_v8, %v1292_v8  ;;  %v1322_v49 = vmul.f32 %v1990_v33, %v1292_v8 }
 0xef6   :  { %v1296_v42 = vsel %vm49_vm0, %v1294_v10, 0.0  ;;  %v1295_v12 = vmul.f32 %v1293_v41, %v1293_v41  ;;  %v1323_v37 = vmul.f32 %v1990_v33, %v1293_v41  ;;  %v1809_v33 = vld [vmem:[%s2312_s10 + $0x38] sm:$0xff]   ;;  %s1895_s10 = smov [#allocation2]  }
 0xef7   :  { %1297 = vadd.xlane.f32.xlu0 %v1296_v42  ;;  %1777 = vmatpush3.bf16.msra.mxu0 %v1809_v33  ;;  %s1520_s9 = sshll.u32 %s1895_s10, 4  ;;  %s1521_s9 = int_to_ptr.vmem [resolvable:$true] %s1520_s9 }
 0xef8   :  { %v1299_v13 = vsel %vm49_vm0, %v1295_v12, 0.0  ;;  %s1858_s2 = scalar_lea.vmem %s1521_s9, 256  ;;  %p1863_p1 = scmp.lt.s32.totalorder %s1521_s9, %s1521_s9 }
 0xef9   :  { %1300 = vadd.xlane.f32.xlu1 %v1299_v13  ;;  %p1859_p0 = scmp.ne.s32.totalorder %s1521_s9, %s1858_s2  ;;  %p1864_p2 = scmp.lt.s32.totalorder %s1858_s2, %s1858_s2 }
 0xefb   :  { %p1865_p3 = por %p1864_p2, %p1863_p1 }
 0xefd   :  { %p1866_p4 = pnand %p1865_p3, %p1859_p0 }
 0xf84   :  { %v1298_v23 = vpop.xlane.xlu0 %1297 }
 0xf85   :  { %v1302_v24 = vmul.f32 0.032258064, %v1298_v23 }
 0xf86   :  { %v1301_v25 = vpop.xlane.xlu1 %1300 }
 0xf87   :  { %1850 = vrsqrt.f32 %v1302_v24  ;;  %v1303_v11 = vmul.f32 0.032258064, %v1301_v25  ;;  %vm1306_vm10 = vcmp.eq.f32.partialorder %v1302_v24, inf  ;;  %v1309_v14 = vand.u32 2147483648, %v1302_v24 }
 0xf88   :  { %vm1308_vm11 = vcmp.eq.f32.partialorder %v1302_v24, 0.0 }
 0xf89   :  { %1852 = vrsqrt.f32 %v1303_v11  ;;  %vm1313_vm12 = vcmp.eq.f32.partialorder %v1303_v11, inf  ;;  %v1316_v31 = vand.u32 2147483648, %v1303_v11  ;;  %vm1315_vm13 = vcmp.eq.f32.partialorder %v1303_v11, 0.0 }
 0xf91   :  { %v1851_v26 = vpop.eup %1850 }
 0xf92   :  { %v1305_v27 = vmul.f32 %v1851_v26, %v1302_v24 }
 0xf93   :  { %v1853_v4 = vpop.eup %1852 }
 0xf94   :  { %v1307_v28 = vsel %vm1306_vm10, %v1302_v24, %v1305_v27  ;;  %v1312_v30 = vmul.f32 %v1853_v4, %v1303_v11 }
 0xf95   :  { %v1310_v29 = vsel %vm1308_vm11, %v1309_v14, %v1307_v28 }
 0xf96   :  { %v1318_v52 = vadd.f32 1e-06, %v1310_v29  ;;  %v1314_v32 = vsel %vm1313_vm12, %v1303_v11, %v1312_v30 }
 0xf97   :  { %v1317_v34 = vsel %vm1315_vm13, %v1316_v31, %v1314_v32 }
 0xf98   :  { %1854 = vrcp.f32 %v1318_v52  ;;  %v1319_v35 = vadd.f32 1e-06, %v1317_v34 }
 0xf9a   :  { %1856 = vrcp.f32 %v1319_v35 }
 0xfa2   :  { %v1855_v36 = vpop.eup %1854 }
 0xfa3   :  { %v1324_v38 = vmul.f32 %v1855_v36, %v1322_v49 }
 0xfa4   :  { %v1857_v40 = vpop.eup %1856 }
 0xfa5   :  { %v1325_v43 = vmul.f32 %v1857_v40, %v1323_v37  ;;  %v1326_v44 = vadd.f32 %v1997_v39, %v1324_v38 }
 0xfa7   :  { %v1327_v45 = vadd.f32 %v1997_v39, %v1325_v43 }
 0xfa9   :  { %v1328_v57 = vpack.c.bf16 %v1327_v45, %v1326_v44 }
 0xfab   :  { %1759 = vmatmul.mubr.msk.bf16.vlgmr.msra.gmra.mrb[48].mxu1 %vm49_vm0, %v1328_v57 }
0x107e   :  { %v1389_v39 = vpop.f32.mrb[48].mxu1 }
0x107f   :  { %v1390_v48 = vadd.f32 %v1558_v47, %v1389_v39  ;;  %v1760_v50 = vpop.f32.mrb[49].mxu1 }
0x1080   :  { %v1392_v51 = vpop.f32.mrb[50].mxu1 }
0x1081   :  { %v1393_v53 = vadd.f32 %v1558_v47, %v1392_v51  ;;  %v1761_v54 = vpop.f32.mrb[51].mxu1  ;;  %v1396_v55 = vmax.f32 %v1390_v48, 0.0 }
0x1083   :  { %v1397_v56 = vmax.f32 %v1393_v53, 0.0 }
0x1085   :  { %v1398_v58 = vpack.c.bf16 %v1397_v56, %v1396_v55 }
0x1087   :  { %1779 = vmatmul.mubr.bf16.vlgmr.msra.gmra.mrb[36].mxu0 %v1398_v58 }
0x115a   :  { %v1504_v59 = vpop.f32.mrb[36].mxu0 }
0x115b   :  { %v1505_v62 = vadd.f32 %v1562_v15, %v1504_v59  ;;  %v1780_v63 = vpop.f32.mrb[37].mxu0 }
0x115c   :  { %v1507_v1 = vpop.f32.mrb[38].mxu0 }
0x115d   :  { %v1511_v3 = vadd.f32 %v1505_v62, %v2224_v0  ;;  %v1508_v5 = vadd.f32 %v1562_v15, %v1507_v1  ;;  %v1781_v61 = vpop.f32.mrb[39].mxu0 }
0x115f   :  { %1513 = vst.msk [vmem:[#allocation2] sm:$0xff] %vm49_vm0, %v1511_v3  ;;  %v1512_v6 = vadd.f32 %v1508_v5, %v2227_v2 }
0x1161   :  { %1514 = vst.msk [vmem:[#allocation2 + $0x8] sm:$0xff] %vm49_vm0, %v1512_v6 }
0x1162   :  { %1869 = shalt.err (!%p1866_p4)
}
0x1163   :  { %s1870_s13 = scalar_lea.hbm %s2314_s12, 256 }
0x1164   :  { %p1871_p5 = scmp.ne.s32.totalorder %s2314_s12, %s1870_s13  ;;  %p1874_p6 = scmp.lt.u32.totalorder %s1870_s13, %s2314_s12 }
0x1166   :  { %p1876_p7 = pnand %p1874_p6, %p1871_p5 }
0x1168   :  { %1879 = shalt.err (!%p1876_p7)
}
0x1169   :  { %s1896_s15 = smov 128   ;;  %s1897_s16 = smov 8  }
0x116a   :  { %1526 = dma.vmem_to_hbm [thread:$0]  %s1521_s9, 256, %s2314_s12, [#allocation3], %s1896_s15, %s1896_s15, %s1897_s16  }
0x116b   :  { %1880 = dma.done.wait [#allocation3], 256  }
0x116c   :  { %1881 = vsyncadd [#allocation3], 4294967040 }
0x116d   :  { %1530 = vsyncpa [#allocation3], 1 }

</bundles_post_ra>
